<compile_context>
chip_gen: v5e
topology: v5e:2x2
jax: 0.10.0
libtpu: 0.0.40
codegen_flags: <defaults>
</compile_context>

<pallas_src>
import numpy as np
import jax
import jax.numpy as jnp
from jax.experimental import pallas as pl
from jax.experimental.pallas import tpu as pltpu


# ----------------------------------------------------------------------------
# Host-side constants (tiny, depend only on static shapes)
# ----------------------------------------------------------------------------
def _adaptive_pool_matrix(in_size, out_size):
    """Row i averages input indices [floor(i*in/out), ceil((i+1)*in/out)) (PyTorch)."""
    m = np.zeros((out_size, in_size), dtype=np.float32)
    for i in range(out_size):
        start = (i * in_size) // out_size
        end = -((-(i + 1) * in_size) // out_size)  # ceil div
        m[i, start:end] = 1.0 / (end - start)
    return m


def _bilinear_matrix(out_size, in_size):
    """F.interpolate(mode='bilinear', align_corners=True) along one axis, (out, in)."""
    m = np.zeros((out_size, in_size), dtype=np.float32)
    for o in range(out_size):
        src = 0.0 if out_size == 1 else o * (in_size - 1) / (out_size - 1)
        i0 = int(np.floor(src))
        i1 = min(i0 + 1, in_size - 1)
        f = src - i0
        m[o, i0] += 1.0 - f
        m[o, i1] += f
    return m


def _round_up(x, m):
    return ((x + m - 1) // m) * m


def _vmem_bytes_estimate(c, cout, sum_s2, n_scales, tp):
    """Rough upper bound on live VMEM for one grid step: double-buffered I/O blocks
    + (double-buffered) weights + elementwise intermediates."""
    f32, bf16 = 4, 2
    io = 2 * (c * tp * f32 + cout * tp * f32 + sum_s2 * tp * bf16)      # x, out, U
    consts = 2 * (((c + cout) * c + cout * c + c + cout) * f32          # W_x, Wb1, biases
                  + 2 * c * n_scales * sum_s2 * f32)                    # block-diag P2
    live = ((c + cout) + 2 * c * n_scales + 4 * c) * tp * f32           # zx, both_all, z/w/wsum/wfeat
    return io + consts + live


def _pick_tiling(p, target, c, cout, sum_s2, n_scales, n_batch, vmem_budget=40 << 20):
    """Pick a pixel tile (multiple of 128) that fits the VMEM budget.  P is zero-
    padded up to a multiple of the tile (padding sliced off after the kernel), so
    there is never a single enormous ragged block."""
    tp = max(128, (min(target, _round_up(p, 128)) // 128) * 128)
    while tp > 128 and _vmem_bytes_estimate(c, cout, sum_s2, n_scales, tp) > vmem_budget:
        tp -= 128
    # v7x megacore: keep >= 2 grid points on the parallel axes so both TensorCores
    # get work even when the batch axis is degenerate.
    if n_batch == 1 and _round_up(p, tp) // tp < 2 and _round_up(p, 128) >= 256:
        tp = max(128, (_round_up(p, 128) // 2 // 128) * 128)
    p_pad = _round_up(p, tp)
    return tp, p_pad


# ----------------------------------------------------------------------------
# Pallas kernel (channel-major: channels on sublanes, pixels on lanes)
# ----------------------------------------------------------------------------
def _make_kernel(n_scales, c):
    two_c = 2 * c

    def kernel(x_ref, wx_ref, bw_ref, wb1_ref, bb_ref, p2_ref, u_ref, out_ref):
        x = x_ref[0]                                                     # (C, tp) f32

        # One matmul over x: rows [:C] -> weight_net term, rows [C:] -> bottleneck
        # "feats" half.  (Row-C slice is a free view when C % 8 == 0.)
        zx = jnp.dot(wx_ref[...], x, preferred_element_type=jnp.float32)  # (C+Cout, tp)
        z = zx[:c] + bw_ref[...]                                         # Ww @ x + bw

        # One matmul rebuilds ALL scales' upsampled maps and their weight_net
        # projections at once: P2 is block-diagonal over scales.
        u = u_ref[...].astype(jnp.float32)                               # bf16 -> f32 (cheap VPU)
        both_all = jnp.dot(p2_ref[0], u,
                           preferred_element_type=jnp.float32)           # (2C*n_scales, tp)

        wsum = jnp.zeros_like(z)
        wfeat = jnp.zeros_like(z)
        for s in range(n_scales):
            ms = both_all[s * two_c:s * two_c + c]                       # upsampled scale map
            wz = both_all[s * two_c + c:(s + 1) * two_c]                 # Ww @ ms
            w = jax.nn.sigmoid(z - wz)                                   # == sigmoid(Ww (x - ms) + bw)
            wsum = wsum + w
            wfeat = wfeat + ms * w

        # sigmoid > 0, so wsum can never be 0: the reference's `wsum==0 -> 1e-6`
        # guard is dead code and dropped (keeps VALU free next to the EUP-heavy loop).
        inv = pl.reciprocal(wsum, approx=True)                           # EUP slot
        inv = inv * (2.0 - wsum * inv)                                   # one Newton step -> ~f32 accurate
        wfeat = wfeat * inv

        # bottleneck(cat([weighted_features, feats])) + ReLU
        out = (jnp.dot(wb1_ref[...], wfeat, preferred_element_type=jnp.float32)
               + zx[c:] + bb_ref[...])
        out_ref[0] = jnp.maximum(out, 0.0).astype(out_ref.dtype)

    return kernel


# ----------------------------------------------------------------------------
# Wrapper
# ----------------------------------------------------------------------------
def contextual_forward(feats, params, sizes=(1, 2, 3, 6), tile_p=1024,
                       out_dtype=jnp.float32):
    N, C, H, W = feats.shape
    Cout = params["bottleneck_w"].shape[0]
    assert params["bottleneck_w"].shape[1] == 2 * C
    P = H * W
    n_scales = len(sizes)
    s2_list = [s * s for s in sizes]
    sum_s2 = sum(s2_list)

    tp, P_pad = _pick_tiling(P, tile_p, C, Cout, sum_s2, n_scales, N)
    num_tiles = P_pad // tp

    # channel-major pixels: free reshape, no transpose anywhere.
    x = feats.reshape(N, C, P)

    # ---- weights (PyTorch (out_ch, in_ch) orientation) ----
    ww = params["weight_net_w"]                                          # (C, C)
    bw = params["weight_net_b"].reshape(C, 1)
    wb1 = params["bottleneck_w"][:, :C]                                  # acts on weighted_features
    wb2 = params["bottleneck_w"][:, C:]                                  # acts on feats
    bb = params["bottleneck_b"].reshape(Cout, 1)
    # Stacked x-weights: one matmul gives both the weight_net term and wb2@x.
    # NOTE: the in-kernel slice at row C is only a free view when C % 8 == 0.
    wx = jnp.concatenate([ww, wb2], axis=0)                              # (C+Cout, C)

    # ---- host constants: fused pooling matrix + fused bilinear-upsample matrix ----
    # TODO(synk): exploit separability (uh (H,s) x uw (W,s)) with 2D pixel tiles to
    # eliminate the U HBM stream entirely; kept dense here for simplicity.
    pool_rows, u_rows = [], []
    for s in sizes:
        ph = _adaptive_pool_matrix(H, s)                                 # (s, H)
        pw = _adaptive_pool_matrix(W, s)                                 # (s, W)
        pool_rows.append(np.einsum("ph,qw->pqhw", ph, pw).reshape(s * s, P))
        uh = _bilinear_matrix(H, s)                                      # (H, s)
        uw = _bilinear_matrix(W, s)                                      # (W, s)
        u_rows.append(np.einsum("hp,wq->pqhw", uh, uw).reshape(s * s, P))
    pool_all = jnp.asarray(np.concatenate(pool_rows, axis=0))            # (sum_s2, P)
    u_all_np = np.concatenate(u_rows, axis=0)                            # (sum_s2, P)
    if P_pad != P:
        u_all_np = np.pad(u_all_np, ((0, 0), (0, P_pad - P)))
    # U is the dominant HBM stream for small/medium C -> stream it in bf16.
    u_all = jnp.asarray(u_all_np, dtype=jnp.bfloat16)

    # ---- tiny glue (plain JAX): adaptive pooling of ALL scales in ONE pass over
    # feats, then per-scale 1x1 convs + weight_net projection, assembled
    # block-diagonally so the kernel rebuilds every scale with one matmul. ----
    pooled_all = jnp.einsum("sp,ncp->ncs", pool_all, x)                  # (N, C, sum_s2)
    blocks = []
    off = 0
    for s2_i, w_s in zip(s2_list, params["scale_w"]):
        pooled_s = pooled_all[:, :, off:off + s2_i]                      # (N, C, s2_i)
        pc = jnp.einsum("dc,ncs->nds", w_s, pooled_s)                    # pooled 1x1 conv
        wpc = jnp.einsum("dc,ncs->nds", ww, pc)                          # Ww @ pooled conv
        blk = jnp.concatenate([pc, wpc], axis=1)                         # (N, 2C, s2_i)
        blocks.append(jnp.pad(blk, ((0, 0), (0, 0), (off, sum_s2 - off - s2_i))))
        off += s2_i
    p2 = jnp.concatenate(blocks, axis=1)                                 # (N, 2C*n_scales, sum_s2)

    if P_pad != P:
        x = jnp.pad(x, ((0, 0), (0, 0), (0, P_pad - P)))

    est = _vmem_bytes_estimate(C, Cout, sum_s2, n_scales, tp)
    # explicit VMEM budget: >= default scoped limits, <= v7x physical 64 MiB.
    vmem_limit = int(min(56 << 20, max(32 << 20, int(est * 1.3))))

    const2 = lambda j, n: (0, 0)
    in_specs = [
        pl.BlockSpec((1, C, tp), lambda j, n: (n, 0, j)),                # feats tile
        pl.BlockSpec((C + Cout, C), const2),                             # [Ww ; Wb_feats]
        pl.BlockSpec((C, 1), const2),                                    # weight_net bias
        pl.BlockSpec((Cout, C), const2),                                 # bottleneck W (wfeat half)
        pl.BlockSpec((Cout, 1), const2),                                 # bottleneck bias
        pl.BlockSpec((1, 2 * C * n_scales, sum_s2), lambda j, n: (n, 0, 0)),  # block-diag pooled maps
        pl.BlockSpec((sum_s2, tp), lambda j, n: (0, j)),                 # fused upsample matrix (bf16)
    ]

    out = pl.pallas_call(
        _make_kernel(n_scales, C),
        out_shape=jax.ShapeDtypeStruct((N, Cout, P_pad), out_dtype),
        grid_spec=pltpu.PrefetchScalarGridSpec(
            num_scalar_prefetch=0,
            grid=(num_tiles, N),               # batch innermost: U tile reused across n
            in_specs=in_specs,
            out_specs=pl.BlockSpec((1, Cout, tp), lambda j, n: (n, 0, j)),
        ),
        compiler_params=pltpu.CompilerParams(
            dimension_semantics=("parallel", "parallel"),
            vmem_limit_bytes=vmem_limit),
    )(x, wx, bw, wb1, bb, p2, u_all)

    if P_pad != P:
        out = out[:, :, :P]
    return out.reshape(N, Cout, H, W)                                    # free reshape back to NCHW


# ----------------------------------------------------------------------------
# Pure-JAX reference (mirrors the PyTorch forward), weights in (out, in) layout
# ----------------------------------------------------------------------------
def _multi_scales_ref(feats, scale_ws, sizes):
    N, C, H, W = feats.shape
    outs = []
    for size, w_s in zip(sizes, scale_ws):
        ph = jnp.asarray(_adaptive_pool_matrix(H, size))
        pw = jnp.asarray(_adaptive_pool_matrix(W, size))
        pooled = jnp.einsum("ph,nchw,qw->ncpq", ph, feats, pw)
        conv = jnp.einsum("dc,ncpq->ndpq", w_s, pooled)
        uh = jnp.asarray(_bilinear_matrix(H, size))
        uw = jnp.asarray(_bilinear_matrix(W, size))
        outs.append(jnp.einsum("hp,ndpq,wq->ndhw", uh, conv, uw))
    return outs


def reference_forward(feats, params, sizes=(1, 2, 3, 6)):
    multi_scales = _multi_scales_ref(feats, params["scale_w"], sizes)
    ww, bw = params["weight_net_w"], params["weight_net_b"]
    weights = [jax.nn.sigmoid(jnp.einsum("dc,nchw->ndhw", ww, feats - ms)
                              + bw[None, :, None, None]) for ms in multi_scales]
    wsum = sum(weights)
    wsum = jnp.where(wsum == 0.0, 1e-6, wsum)
    wfeat = sum(m * w for m, w in zip(multi_scales, weights)) / wsum
    cat = jnp.concatenate([wfeat, feats], axis=1)
    out = jnp.einsum("dc,nchw->ndhw", params["bottleneck_w"], cat) \
        + params["bottleneck_b"][None, :, None, None]
    return jnp.maximum(out, 0.0)


if __name__ == "__main__":
    # Small, module-consistent shapes: features=8, out_features=32, N=2, H=W=32
    N, C, H, W = 2, 8, 32, 32
    Cout = 32
    sizes = (1, 2, 3, 6)

    key = jax.random.PRNGKey(0)
    ks = jax.random.split(key, 9)
    # 1x1 conv weights in PyTorch orientation: (out_channels, in_channels)
    params = {
        "scale_w": [jax.random.normal(ks[i], (C, C), jnp.float32) * 0.2 for i in range(4)],
        "weight_net_w": jax.random.normal(ks[4], (C, C), jnp.float32) * 0.2,
        "weight_net_b": jax.random.normal(ks[5], (C,), jnp.float32) * 0.1,
        "bottleneck_w": jax.random.normal(ks[6], (Cout, 2 * C), jnp.float32) * 0.2,
        "bottleneck_b": jax.random.normal(ks[7], (Cout,), jnp.float32) * 0.1,
    }
    feats = jax.random.normal(ks[8], (N, C, H, W), jnp.float32)

    out = jax.block_until_ready(contextual_forward(feats, params, sizes=sizes))
    ref = jax.block_until_ready(reference_forward(feats, params, sizes=sizes))
    # atol slightly above 2e-3: the bilinear-interp matrix is streamed in bf16.
    np.testing.assert_allclose(np.asarray(out), np.asarray(ref), rtol=2e-3, atol=3e-3)
    assert out.shape == (N, Cout, H, W)

    print("KERNEL_OK")
</pallas_src>

<mosaic_0001>
module attributes {stable_mosaic.version = 11 : i64} {
  func.func @kernel(%arg0: i32, %arg1: i32, %arg2: memref<1x8x1024xf32, #tpu.memory_space<vmem>>, %arg3: memref<40x8xf32, #tpu.memory_space<vmem>>, %arg4: memref<8x1xf32, #tpu.memory_space<vmem>>, %arg5: memref<32x8xf32, #tpu.memory_space<vmem>>, %arg6: memref<32x1xf32, #tpu.memory_space<vmem>>, %arg7: memref<1x64x50xf32, #tpu.memory_space<vmem>>, %arg8: memref<50x1024xbf16, #tpu.memory_space<vmem>>, %arg9: memref<1x32x1024xf32, #tpu.memory_space<vmem>>) attributes {dimension_semantics = [#tpu.dimension_semantics<parallel>, #tpu.dimension_semantics<parallel>], iteration_bounds = array<i64: 1, 2>, scalar_prefetch = 0 : i64, scratch_operands = 0 : i64, tpu.core_type = #tpu.core_type<tc>, window_params = [{transform_indices = @transform_0, window_bounds = array<i64: 1, 8, 1024>}, {pipeline_mode = #tpu.pipeline_mode<synchronous>, transform_indices = @transform_1, window_bounds = array<i64: 40, 8>}, {pipeline_mode = #tpu.pipeline_mode<synchronous>, transform_indices = @transform_2, window_bounds = array<i64: 8, 1>}, {pipeline_mode = #tpu.pipeline_mode<synchronous>, transform_indices = @transform_3, window_bounds = array<i64: 32, 8>}, {pipeline_mode = #tpu.pipeline_mode<synchronous>, transform_indices = @transform_4, window_bounds = array<i64: 32, 1>}, {transform_indices = @transform_5, window_bounds = array<i64: 1, 64, 50>}, {transform_indices = @transform_6, window_bounds = array<i64: 50, 1024>}, {transform_indices = @transform_7, window_bounds = array<i64: 1, 32, 1024>}]} {
    %c0 = arith.constant 0 : index
    %c0_0 = arith.constant 0 : index
    %c0_1 = arith.constant 0 : index
    %0 = vector.load %arg2[%c0, %c0_0, %c0_1] : memref<1x8x1024xf32, #tpu.memory_space<vmem>>, vector<1x8x1024xf32>
    %1 = vector.shape_cast %0 : vector<1x8x1024xf32> to vector<8x1024xf32>
    %c0_2 = arith.constant 0 : index
    %c0_3 = arith.constant 0 : index
    %2 = vector.load %arg3[%c0_2, %c0_3] : memref<40x8xf32, #tpu.memory_space<vmem>>, vector<40x8xf32>
    %cst = arith.constant dense<0.000000e+00> : vector<40x1024xf32>
    %3 = tpu.matmul %2, %1, %cst {dimension_numbers = #tpu.dot_dimension_numbers<[1], [0], [0], [1], [0, 0, 1, 1], [], []>} : vector<40x8xf32>, vector<8x1024xf32>, vector<40x1024xf32> -> vector<40x1024xf32>
    %4 = vector.extract_strided_slice %3 {offsets = [0, 0], sizes = [8, 1024], strides = [1, 1]} : vector<40x1024xf32> to vector<8x1024xf32>
    %c0_4 = arith.constant 0 : index
    %c0_5 = arith.constant 0 : index
    %5 = vector.load %arg4[%c0_4, %c0_5] : memref<8x1xf32, #tpu.memory_space<vmem>>, vector<8x1xf32>
    %6 = vector.broadcast %5 : vector<8x1xf32> to vector<8x1024xf32>
    %7 = arith.addf %4, %6 : vector<8x1024xf32>
    %c0_6 = arith.constant 0 : index
    %c0_7 = arith.constant 0 : index
    %8 = vector.load %arg8[%c0_6, %c0_7] : memref<50x1024xbf16, #tpu.memory_space<vmem>>, vector<50x1024xbf16>
    %9 = arith.extf %8 : vector<50x1024xbf16> to vector<50x1024xf32>
    %c0_8 = arith.constant 0 : index
    %c0_9 = arith.constant 0 : index
    %c0_10 = arith.constant 0 : index
    %10 = vector.load %arg7[%c0_8, %c0_9, %c0_10] : memref<1x64x50xf32, #tpu.memory_space<vmem>>, vector<1x64x50xf32>
    %11 = vector.shape_cast %10 : vector<1x64x50xf32> to vector<64x50xf32>
    %cst_11 = arith.constant dense<0.000000e+00> : vector<64x1024xf32>
    %12 = tpu.matmul %11, %9, %cst_11 {dimension_numbers = #tpu.dot_dimension_numbers<[1], [0], [0], [1], [0, 0, 1, 1], [], []>} : vector<64x50xf32>, vector<50x1024xf32>, vector<64x1024xf32> -> vector<64x1024xf32>
    %cst_12 = arith.constant 0.000000e+00 : f32
    %13 = vector.broadcast %cst_12 : f32 to vector<8x1024xf32>
    %cst_13 = arith.constant 0.000000e+00 : f32
    %14 = vector.broadcast %cst_13 : f32 to vector<8x1024xf32>
    %15 = vector.extract_strided_slice %12 {offsets = [0, 0], sizes = [8, 1024], strides = [1, 1]} : vector<64x1024xf32> to vector<8x1024xf32>
    %16 = vector.extract_strided_slice %12 {offsets = [8, 0], sizes = [8, 1024], strides = [1, 1]} : vector<64x1024xf32> to vector<8x1024xf32>
    %17 = arith.subf %7, %16 : vector<8x1024xf32>
    %18 = arith.negf %17 : vector<8x1024xf32>
    %19 = math.exp %18 : vector<8x1024xf32>
    %cst_14 = arith.constant 1.000000e+00 : f32
    %20 = vector.broadcast %cst_14 : f32 to vector<8x1024xf32>
    %21 = arith.addf %20, %19 : vector<8x1024xf32>
    %22 = arith.divf %20, %21 : vector<8x1024xf32>
    %23 = arith.addf %13, %22 : vector<8x1024xf32>
    %24 = arith.mulf %15, %22 : vector<8x1024xf32>
    %25 = arith.addf %14, %24 : vector<8x1024xf32>
    %26 = vector.extract_strided_slice %12 {offsets = [16, 0], sizes = [8, 1024], strides = [1, 1]} : vector<64x1024xf32> to vector<8x1024xf32>
    %27 = vector.extract_strided_slice %12 {offsets = [24, 0], sizes = [8, 1024], strides = [1, 1]} : vector<64x1024xf32> to vector<8x1024xf32>
    %28 = arith.subf %7, %27 : vector<8x1024xf32>
    %29 = arith.negf %28 : vector<8x1024xf32>
    %30 = math.exp %29 : vector<8x1024xf32>
    %cst_15 = arith.constant 1.000000e+00 : f32
    %31 = vector.broadcast %cst_15 : f32 to vector<8x1024xf32>
    %32 = arith.addf %31, %30 : vector<8x1024xf32>
    %33 = arith.divf %31, %32 : vector<8x1024xf32>
    %34 = arith.addf %23, %33 : vector<8x1024xf32>
    %35 = arith.mulf %26, %33 : vector<8x1024xf32>
    %36 = arith.addf %25, %35 : vector<8x1024xf32>
    %37 = vector.extract_strided_slice %12 {offsets = [32, 0], sizes = [8, 1024], strides = [1, 1]} : vector<64x1024xf32> to vector<8x1024xf32>
    %38 = vector.extract_strided_slice %12 {offsets = [40, 0], sizes = [8, 1024], strides = [1, 1]} : vector<64x1024xf32> to vector<8x1024xf32>
    %39 = arith.subf %7, %38 : vector<8x1024xf32>
    %40 = arith.negf %39 : vector<8x1024xf32>
    %41 = math.exp %40 : vector<8x1024xf32>
    %cst_16 = arith.constant 1.000000e+00 : f32
    %42 = vector.broadcast %cst_16 : f32 to vector<8x1024xf32>
    %43 = arith.addf %42, %41 : vector<8x1024xf32>
    %44 = arith.divf %42, %43 : vector<8x1024xf32>
    %45 = arith.addf %34, %44 : vector<8x1024xf32>
    %46 = arith.mulf %37, %44 : vector<8x1024xf32>
    %47 = arith.addf %36, %46 : vector<8x1024xf32>
    %48 = vector.extract_strided_slice %12 {offsets = [48, 0], sizes = [8, 1024], strides = [1, 1]} : vector<64x1024xf32> to vector<8x1024xf32>
    %49 = vector.extract_strided_slice %12 {offsets = [56, 0], sizes = [8, 1024], strides = [1, 1]} : vector<64x1024xf32> to vector<8x1024xf32>
    %50 = arith.subf %7, %49 : vector<8x1024xf32>
    %51 = arith.negf %50 : vector<8x1024xf32>
    %52 = math.exp %51 : vector<8x1024xf32>
    %cst_17 = arith.constant 1.000000e+00 : f32
    %53 = vector.broadcast %cst_17 : f32 to vector<8x1024xf32>
    %54 = arith.addf %53, %52 : vector<8x1024xf32>
    %55 = arith.divf %53, %54 : vector<8x1024xf32>
    %56 = arith.addf %45, %55 : vector<8x1024xf32>
    %57 = arith.mulf %48, %55 : vector<8x1024xf32>
    %58 = arith.addf %47, %57 : vector<8x1024xf32>
    %59 = tpu.reciprocal %56 {approx = true} : vector<8x1024xf32> -> vector<8x1024xf32>
    %60 = arith.mulf %56, %59 : vector<8x1024xf32>
    %cst_18 = arith.constant 2.000000e+00 : f32
    %61 = vector.broadcast %cst_18 : f32 to vector<8x1024xf32>
    %62 = arith.subf %61, %60 : vector<8x1024xf32>
    %63 = arith.mulf %59, %62 : vector<8x1024xf32>
    %64 = arith.mulf %58, %63 : vector<8x1024xf32>
    %c0_19 = arith.constant 0 : index
    %c0_20 = arith.constant 0 : index
    %65 = vector.load %arg5[%c0_19, %c0_20] : memref<32x8xf32, #tpu.memory_space<vmem>>, vector<32x8xf32>
    %cst_21 = arith.constant dense<0.000000e+00> : vector<32x1024xf32>
    %66 = tpu.matmul %65, %64, %cst_21 {dimension_numbers = #tpu.dot_dimension_numbers<[1], [0], [0], [1], [0, 0, 1, 1], [], []>} : vector<32x8xf32>, vector<8x1024xf32>, vector<32x1024xf32> -> vector<32x1024xf32>
    %67 = vector.extract_strided_slice %3 {offsets = [8, 0], sizes = [32, 1024], strides = [1, 1]} : vector<40x1024xf32> to vector<32x1024xf32>
    %68 = arith.addf %66, %67 : vector<32x1024xf32>
    %c0_22 = arith.constant 0 : index
    %c0_23 = arith.constant 0 : index
    %69 = vector.load %arg6[%c0_22, %c0_23] : memref<32x1xf32, #tpu.memory_space<vmem>>, vector<32x1xf32>
    %70 = vector.broadcast %69 : vector<32x1xf32> to vector<32x1024xf32>
    %71 = arith.addf %68, %70 : vector<32x1024xf32>
    %cst_24 = arith.constant 0.000000e+00 : f32
    %72 = vector.broadcast %cst_24 : f32 to vector<32x1024xf32>
    %73 = arith.maximumf %71, %72 : vector<32x1024xf32>
    %c0_25 = arith.constant 0 : index
    %c0_26 = arith.constant 0 : index
    %c0_27 = arith.constant 0 : index
    %74 = vector.load %arg9[%c0_25, %c0_26, %c0_27] : memref<1x32x1024xf32, #tpu.memory_space<vmem>>, vector<1x32x1024xf32>
    %75 = vector.shape_cast %74 : vector<1x32x1024xf32> to vector<32x1024xf32>
    %76 = vector.shape_cast %73 : vector<32x1024xf32> to vector<1x32x1024xf32>
    tpu.vector_store %arg9[%c0_25, %c0_26, %c0_27], %76 {strides = array<i32>} : memref<1x32x1024xf32, #tpu.memory_space<vmem>>, vector<1x32x1024xf32>,
    return
  }
  func.func @transform_0(%arg0: i32, %arg1: i32) -> (i32, i32, i32) {
    %c0_i32 = arith.constant 0 : i32
    %c0_i32_0 = arith.constant 0 : i32
    return %arg1, %c0_i32, %arg0 : i32, i32, i32
  }
  func.func @transform_1(%arg0: i32, %arg1: i32) -> (i32, i32) {
    %c0_i32 = arith.constant 0 : i32
    %c0_i32_0 = arith.constant 0 : i32
    %c0_i32_1 = arith.constant 0 : i32
    return %c0_i32, %c0_i32_0 : i32, i32
  }
  func.func @transform_2(%arg0: i32, %arg1: i32) -> (i32, i32) {
    %c0_i32 = arith.constant 0 : i32
    %c0_i32_0 = arith.constant 0 : i32
    %c0_i32_1 = arith.constant 0 : i32
    return %c0_i32, %c0_i32_0 : i32, i32
  }
  func.func @transform_3(%arg0: i32, %arg1: i32) -> (i32, i32) {
    %c0_i32 = arith.constant 0 : i32
    %c0_i32_0 = arith.constant 0 : i32
    %c0_i32_1 = arith.constant 0 : i32
    return %c0_i32, %c0_i32_0 : i32, i32
  }
  func.func @transform_4(%arg0: i32, %arg1: i32) -> (i32, i32) {
    %c0_i32 = arith.constant 0 : i32
    %c0_i32_0 = arith.constant 0 : i32
    %c0_i32_1 = arith.constant 0 : i32
    return %c0_i32, %c0_i32_0 : i32, i32
  }
  func.func @transform_5(%arg0: i32, %arg1: i32) -> (i32, i32, i32) {
    %c0_i32 = arith.constant 0 : i32
    %c0_i32_0 = arith.constant 0 : i32
    %c0_i32_1 = arith.constant 0 : i32
    return %arg1, %c0_i32, %c0_i32_0 : i32, i32, i32
  }
  func.func @transform_6(%arg0: i32, %arg1: i32) -> (i32, i32) {
    %c0_i32 = arith.constant 0 : i32
    %c0_i32_0 = arith.constant 0 : i32
    return %c0_i32, %arg0 : i32, i32
  }
  func.func @transform_7(%arg0: i32, %arg1: i32) -> (i32, i32, i32) {
    %c0_i32 = arith.constant 0 : i32
    %c0_i32_0 = arith.constant 0 : i32
    return %arg1, %c0_i32, %arg0 : i32, i32, i32
  }
}

</mosaic_0001>

<bundles_post_ra>
// kernel: tpu_custom_call.1
= control target key start
LH: loop header
LB: loop body
LE: loop exit
PB: predicated region body
PF: predicated region fallthrough
CT: control target
= control target key end

     0   :  { %12 = vsyncpa [#allocation3], 0  ;;  %s4993_s0 = inlined_call_operand.hbm [shape: f32[2,8,1024], index: 0, kind: input, shape index: {}]   ;;  %s4994_s1 = inlined_call_operand.vmem [shape: f32[40,8], index: 1, kind: input, shape index: {}]   ;;  %s4995_s2 = inlined_call_operand.vmem [shape: f32[8,1], index: 2, kind: input, shape index: {}]   ;;  %s4996_s3 = inlined_call_operand.vmem [shape: f32[32,8], index: 3, kind: input, shape index: {}]   ;;  %s4997_s4 = inlined_call_operand.vmem [shape: f32[32,1], index: 4, kind: input, shape index: {}]   ;;  %s4998_s5 = inlined_call_operand.vmem [shape: f32[2,64,50], index: 5, kind: input, shape index: {}]   ;;  %s4999_s6 = inlined_call_operand.vmem [shape: bf16[50,1024], index: 6, kind: input, shape index: {}]   ;;  %s5000_s7 = inlined_call_operand.hbm [shape: f32[2,32,1024], index: 7, kind: output, shape index: {}]  }
   0x1   :  { %14 = vsyncpa [#allocation3 + $0x1], 0 }
   0x2   :  { %15 = vsyncpa [#allocation4], 0 }
   0x3   :  { %17 = vsyncpa [#allocation4 + $0x1], 0  ;;  %s2970_s24 = smov 0   ;;  %s2972_s25 = smov 0  }
   0x4   :  { %s2974_s26 = smov 0   ;;  %s2976_s27 = smov 0  }
   0x5   :  { %s2978_s28 = smov 0   ;;  %s2980_s29 = smov 0  }
   0x6 LB: > { %s2404_s30 = sadd.s32 4294967295, %s2925_s29   ;;  %s2405_s8 = sadd.s32 4294967294, %s2925_s29   ;;  %s2925_s29 = sphi %s2980_s29, %s23_s29   ;;  %s2921_s28 = sphi %s2978_s28, %s5329_s28   ;;  %s2917_s27 = sphi %s2976_s27, %s5328_s27   ;;  %s2913_s26 = sphi %s2974_s26, %s5327_s26   ;;  %s2909_s25 = sphi %s2972_s25, %s5326_s25   ;;  %s2905_s24 = sphi %s2970_s24, %s5325_s24  }
   0x7   : > { %s32_s9 = sadd.s32 1, %s2921_s28  ;;  %s44_s10 = sadd.s32 1, %s2913_s26 }
   0x8   : > { %p33_p0 = scmp.ge.s32.totalorder %s32_s9, 2  ;;  %p51_p1 = scmp.ne.s32.totalorder %s2913_s26, %s2909_s25 }
   0x9   : > { %p52_p2 = scmp.eq.s32.totalorder %s2925_s29, 0  ;;  %p57_p3 = scmp.ne.s32.totalorder %s2909_s25, %s2905_s24 }
   0xa   : > { %s5331_s9 = smov (%p33_p0, %s32_s9), 0  ;;  %p58_p5 = scmp.eq.s32.totalorder %s2404_s30, 0 }
   0xb   : > { %p3011_p4 = por %p52_p2, %p51_p1  ;;  %s39_s12 = ssub.s32 %s2921_s28, %s5331_s9 }
   0xc   : > { %p219_p6 = scmp.eq.s32.totalorder %s2404_s30, 1  ;;  %p42_p7 = scmp.eq.s32.totalorder %s39_s12, 0 }
   0xd   : > { %p3017_p8 = por %p58_p5, %p57_p3  ;;  %p225_p10 = scmp.eq.s32.totalorder %s2405_s8, 1 }
   0xe   : > { %p3021_p9 = por %p219_p6, %p51_p1  ;;  %p2408_p12 = scmp.ge.s32.totalorder %s2925_s29, 2 }
   0xf   : > { %s3026_s15 = scalar_select %p42_p7, %s2913_s26, %s44_s10  }
  0x10   : > { %p3028_p11 = por %p225_p10, %p57_p3  ;;  %p2613_p13 = scmp.lt.s32.totalorder %s2925_s29, 2 }
  0x11   : > { %s266_s17 = sand.u32 1, %s2913_s26   ;;  %s2598_s19 = sshll.u32 %s2921_s28, 6 }
  0x12   : > { %s2409_s18 = sshll.u32 %s266_s17, 6  ;;  %s277_s22 = scalar_lea.hbm %s4993_s0, %s2598_s19 }
  0x13   : > { %s270_s23 = scalar_lea.vmem [#allocation2], %s2409_s18  ;;  %s279_s12 = sshll.u32 %s277_s22, 4  ;;  %s280_s12 = int_to_ptr.hbm [resolvable:$true] %s279_s12 }
  0x14   : > { %s281_s30 = sshll.u32 %s270_s23, 4  ;;  %p2606_p0 = pnand %p2613_p13, %p3011_p4  ;;  %s282_s30 = int_to_ptr.vmem [resolvable:$true] %s281_s30 }
  0x15   : > { %p2412_p1 = scmp.ge.s32.totalorder %s2925_s29, 1  ;;  %p294_p2 = scmp.lt.s32.totalorder %s2925_s29, 3 }
  0x16   : > { %s267_s8 = scalar_lea.sflag [#allocation3], %s266_s17 }
  0x17   : > { %2608 = dma.hbm_to_vmem [thread:$0]  (!%p2606_p0), %s280_s12, 1024, %s282_s30, %s267_s8  }
  0x18   : > { %p295_p3 = pnand %p2412_p1, %p294_p2 }
  0x1a   : > { %298 = sbr.rel (%p295_p3) target bundleno = 627 (0x273), region = 48 }
  0x1f   : > { %s3044_s10 = sand.u32 1, %s2909_s25  }
  0x20   : > { %s2413_s19 = sshll.u32 %s3044_s10, 6  ;;  %s301_s18 = scalar_lea.sflag [#allocation3], %s3044_s10 }
  0x21   : > { %s304_s20 = scalar_lea.vmem [#allocation2], %s2413_s19 }
  0x22   : > { %2896 = dma.done.wait (%p3017_p8), %s301_s18, 1024  }
  0x23   : > { %2898 = vsyncadd (%p3017_p8), %s301_s18, 4294966272  ;;  %v2927_v0 = vmov 0   ;;  %v359_v1 = vld [vmem:[%s304_s20] sm:$0xff]  ;;  %v360_v2 = vld [vmem:[%s304_s20 + $0x8] sm:$0xff]  ;;  %vm5015_vm0 = vcmask 64512   ;;  %vm775_vm1 = vcmask 1041408  }
  0x24   : > { %2666 = vset.pattern.permute.xlu0 %v2927_v0  ;;  %2667 = vset.pattern.permute.xlu1 %v2927_v0  ;;  %v361_v3 = vld [vmem:[%s304_s20 + $0x10] sm:$0xff]  ;;  %v362_v4 = vld [vmem:[%s304_s20 + $0x18] sm:$0xff]  ;;  %v3055_v5 = vld [vmem:[%s4994_s1] sm:$0xff]  ;;  %p347_p4 = scmp.lt.s32.totalorder %s2917_s27, 1  ;;  %vm750_vm2 = vcmask 408576   ;;  %s2414_s30 = sshll.u32 %s3044_s10, 8 }
  0x25   : > { %2668 = vset.pattern.permute.xlu2 %v2927_v0  ;;  %403 = vmatpush.msra.mxu0 %v359_v1  ;;  %v644_v6 = vld [vmem:[%s4995_s2] sm:$0xff]  ;;  %v365_v7 = vld [vmem:[%s304_s20 + $0x30] sm:$0xff]  ;;  %v366_v8 = vld [vmem:[%s304_s20 + $0x38] sm:$0xff]  ;;  %s4852_s12 = scalar_lea.vmem [#allocation5], %s2414_s30  ;;  %s2600_s8 = sshll.u32 %s2917_s27, 8 }
  0x26   : > { %435 = vmatpush.msra.mxu1 %v360_v2  ;;  %467 = vmatpush.msra.mxu2 %v361_v3  ;;  %v363_v9 = vld [vmem:[%s304_s20 + $0x20] sm:$0xff]  ;;  %v364_v10 = vld [vmem:[%s304_s20 + $0x28] sm:$0xff]  ;;  %v3084_v12 = vld [vmem:[%s4994_s1 + $0x10] sm:$0xff]  ;;  %s348_s22 = scalar_select %p347_p4, %s2917_s27, 1 }
  0x27   : > { %499 = vmatpush.msra.mxu3 %v362_v4  ;;  %2417 = vmatmul.msk.f32.vlgmr.msra.gmra.mxu0 %vm5015_vm0, %v3055_v5  ;;  %v3071_v11 = vld [vmem:[%s4994_s1 + $0x8] sm:$0xff]  ;;  %v3097_v13 = vld [vmem:[%s4994_s1 + $0x18] sm:$0xff]  ;;  %v3110_v14 = vld [vmem:[%s4994_s1 + $0x20] sm:$0xff]  ;;  %s2286_s11 = scalar_lea.hbm %s5000_s7, %s2600_s8  ;;  %s2287_s17 = sshll.u32 %s4852_s12, 4  ;;  %s2288_s17 = int_to_ptr.vmem [resolvable:$true] %s2287_s17 }
  0x28   : > { %2422 = vmatmul.msk.f32.vlgmr.msra.gmra.mxu1 %vm5015_vm0, %v3055_v5  ;;  %2427 = vmatmul.msk.f32.vlgmr.msra.gmra.mxu2 %vm5015_vm0, %v3055_v5  ;;  %v682_v15 = vld [vmem:[%s4999_s6 + $0xc0] sm:$0x11]  ;;  %v683_v16 = vld [vmem:[%s4999_s6 + $0xc8] sm:$0x11]  ;;  %s2599_s23 = sshll.u32 %s348_s22, 6  ;;  %v681_v62 = vld [vmem:[%s4999_s6 + $0xb8] sm:$0xff] }
  0x29   : > { %2432 = vmatmul.msk.f32.vlgmr.msra.gmra.mxu3 %vm5015_vm0, %v3055_v5  ;;  %647 = vperm.xlu0 %2666, %v644_v6   ;;  %v678_v17 = vld [vmem:[%s4999_s6 + $0xa0] sm:$0xff]  ;;  %v734_v18 = vunpack.c.l.bf16 %v682_v15  ;;  %v735_v19 = vunpack.c.h.bf16 %v682_v15  ;;  %v736_v20 = vunpack.c.l.bf16 %v683_v16  ;;  %v737_v21 = vunpack.c.h.bf16 %v683_v16  ;;  %v679_v22 = vld [vmem:[%s4999_s6 + $0xa8] sm:$0xff]  ;;  %v685_v57 = vld [vmem:[%s4999_s6 + $0xd8] sm:$0x11]  ;;  %s3214_s18 = scalar_lea.vmem %s4998_s5, %s2599_s23  ;;  %s2289_s13 = sshll.u32 %s2286_s11, 4  ;;  %s2290_s13 = int_to_ptr.hbm [resolvable:$true] %s2289_s13 }
  0x2a   : > { %595 = vmatpush.msrb.mxu2 %v365_v7  ;;  %627 = vmatpush.msrb.mxu3 %v366_v8  ;;  %v726_v23 = vunpack.c.l.bf16 %v678_v17  ;;  %v727_v24 = vunpack.c.h.bf16 %v678_v17  ;;  %v728_v25 = vunpack.c.l.bf16 %v679_v22  ;;  %v729_v26 = vunpack.c.h.bf16 %v679_v22  ;;  %v674_v27 = vld [vmem:[%s4999_s6 + $0x80] sm:$0xff]  ;;  %v675_v28 = vld [vmem:[%s4999_s6 + $0x88] sm:$0xff]  ;;  %v684_v63 = vld [vmem:[%s4999_s6 + $0xd0] sm:$0x11]  ;;  %s2273_s27 = scalar_lea.sflag [#allocation4], %s3044_s10  ;;  %s2857_s21 = sshra.s32 %s2290_s13, 4  ;;  %s2858_s21 = int_to_ptr.hbm [resolvable:$true] %s2857_s21 }
  0x2b   : > { %531 = vmatpush.msrb.mxu0 %v363_v9  ;;  %563 = vmatpush.msrb.mxu1 %v364_v10  ;;  %v718_v29 = vunpack.c.l.bf16 %v674_v27  ;;  %v719_v30 = vunpack.c.h.bf16 %v674_v27  ;;  %v720_v31 = vunpack.c.l.bf16 %v675_v28  ;;  %v721_v32 = vunpack.c.h.bf16 %v675_v28  ;;  %v670_v33 = vld [vmem:[%s4999_s6 + $0x60] sm:$0xff]  ;;  %v671_v34 = vld [vmem:[%s4999_s6 + $0x68] sm:$0xff]  ;;  %v3247_v4 = vld [vmem:[%s3214_s18 + $0x10] sm:$0xff]  ;;  %s2859_s22 = scalar_lea.hbm %s2858_s21, 256  ;;  %s2863_s30 = scalar_lea.hbm %s5000_s7, 512 }
  0x2c   : > { %2475 = vmatpush.msk.msra.mxu2 %vm775_vm1, %v736_v20  ;;  %2484 = vmatpush.msk.msra.mxu3 %vm775_vm1, %v737_v21  ;;  %v710_v35 = vunpack.c.l.bf16 %v670_v33  ;;  %v711_v36 = vunpack.c.h.bf16 %v670_v33  ;;  %v712_v37 = vunpack.c.l.bf16 %v671_v34  ;;  %v713_v38 = vunpack.c.h.bf16 %v671_v34  ;;  %v666_v39 = vld [vmem:[%s4999_s6 + $0x40] sm:$0xff]  ;;  %v667_v40 = vld [vmem:[%s4999_s6 + $0x48] sm:$0xff]  ;;  %v680_v8 = vld [vmem:[%s4999_s6 + $0xb0] sm:$0xff]  ;;  %p2860_p5 = scmp.ne.s32.totalorder %s2858_s21, %s2859_s22  ;;  %p2864_p8 = scmp.lt.s32.totalorder %s2858_s21, %s5000_s7 }
  0x2d   : > { %2457 = vmatpush.msk.msra.mxu0 %vm775_vm1, %v734_v18  ;;  %2466 = vmatpush.msk.msra.mxu1 %vm775_vm1, %v735_v19  ;;  %v702_v41 = vunpack.c.l.bf16 %v666_v39  ;;  %v703_v42 = vunpack.c.h.bf16 %v666_v39  ;;  %v704_v43 = vunpack.c.l.bf16 %v667_v40  ;;  %v705_v44 = vunpack.c.h.bf16 %v667_v40  ;;  %v662_v45 = vld [vmem:[%s4999_s6 + $0x20] sm:$0xff]  ;;  %v663_v46 = vld [vmem:[%s4999_s6 + $0x28] sm:$0xff]  ;;  %v672_v15 = vld [vmem:[%s4999_s6 + $0x70] sm:$0xff]  ;;  %p2865_p10 = scmp.lt.s32.totalorder %s2863_s30, %s2859_s22 }
  0x2e   : > { %892 = vmatpush.msra.mxu2 %v728_v25  ;;  %933 = vmatpush.msra.mxu3 %v729_v26  ;;  %v658_v47 = vld [vmem:[%s4999_s6] sm:$0xff]  ;;  %v694_v48 = vunpack.c.l.bf16 %v662_v45  ;;  %v695_v49 = vunpack.c.h.bf16 %v662_v45  ;;  %v659_v50 = vld [vmem:[%s4999_s6 + $0x8] sm:$0xff]  ;;  %v696_v51 = vunpack.c.l.bf16 %v663_v46  ;;  %v697_v52 = vunpack.c.h.bf16 %v663_v46  ;;  %v673_v16 = vld [vmem:[%s4999_s6 + $0x78] sm:$0xff]  ;;  %p2861_p6 = pnand %p2860_p5, %p3021_p9 }
  0x2f   : > { %2418 = vmatmul.msk.f32.gmra.mxu0 %vm5015_vm0, %v3071_v11  ;;  %851 = vmatpush.msra.mxu1 %v727_v24  ;;  %v686_v53 = vunpack.c.l.bf16 %v658_v47  ;;  %v687_v54 = vunpack.c.h.bf16 %v658_v47  ;;  %v688_v55 = vunpack.c.l.bf16 %v659_v50  ;;  %v689_v56 = vunpack.c.h.bf16 %v659_v50  ;;  %v3219_v60 = vld [vmem:[%s3214_s18] sm:$0xff]  ;;  %v3230_v61 = vld [vmem:[%s3214_s18 + $0x8] sm:$0xff]  ;;  %v668_v21 = vld [vmem:[%s4999_s6 + $0x50] sm:$0xff]  ;;  %p2866_p13 = por %p2865_p10, %p2864_p8 }
  0x30   : > { %2423 = vmatmul.msk.f32.gmra.mxu1 %vm5015_vm0, %v3071_v11  ;;  %2428 = vmatmul.msk.f32.gmra.mxu2 %vm5015_vm0, %v3071_v11  ;;  %v740_v58 = vunpack.c.l.bf16 %v685_v57  ;;  %v741_v59 = vunpack.c.h.bf16 %v685_v57  ;;  %v732_v0 = vunpack.c.l.bf16 %v681_v62  ;;  %v733_v1 = vunpack.c.h.bf16 %v681_v62  ;;  %v669_v22 = vld [vmem:[%s4999_s6 + $0x58] sm:$0xff]  ;;  %v664_v27 = vld [vmem:[%s4999_s6 + $0x30] sm:$0xff]  ;;  %v2152_v40 = vld [vmem:[%s4997_s4] sm:$0xff]  ;;  %p2862_p7 = pneg %p2861_p6 }
  0x31   : > { %2433 = vmatmul.msk.f32.gmra.mxu3 %vm5015_vm0, %v3071_v11  ;;  %810 = vmatpush.msra.mxu0 %v726_v23  ;;  %v738_v2 = vunpack.c.l.bf16 %v684_v63  ;;  %v739_v3 = vunpack.c.h.bf16 %v684_v63  ;;  %v730_v9 = vunpack.c.l.bf16 %v680_v8  ;;  %v731_v10 = vunpack.c.h.bf16 %v680_v8  ;;  %v665_v28 = vld [vmem:[%s4999_s6 + $0x38] sm:$0xff] }
  0x32   : > { %852 = vmatpush.msra.mxu1 %v719_v30  ;;  %893 = vmatpush.msra.mxu2 %v720_v31  ;;  %v714_v17 = vunpack.c.l.bf16 %v672_v15  ;;  %v715_v18 = vunpack.c.h.bf16 %v672_v15  ;;  %v716_v19 = vunpack.c.l.bf16 %v673_v16  ;;  %v717_v20 = vunpack.c.h.bf16 %v673_v16  ;;  %v3298_v31 = vld [vmem:[%s3214_s18 + $0x20] sm:$0xff]  ;;  %v661_v33 = vld [vmem:[%s4999_s6 + $0x18] sm:$0xff]  ;;  %p2867_p0 = pnand %p2866_p13, %p2862_p7 }
  0x33   : > { %811 = vmatpush.msra.mxu0 %v718_v29  ;;  %934 = vmatpush.msra.mxu3 %v721_v32  ;;  %v706_v23 = vunpack.c.l.bf16 %v668_v21  ;;  %v707_v24 = vunpack.c.h.bf16 %v668_v21  ;;  %v708_v25 = vunpack.c.l.bf16 %v669_v22  ;;  %v709_v26 = vunpack.c.h.bf16 %v669_v22  ;;  %v660_v32 = vld [vmem:[%s4999_s6 + $0x10] sm:$0xff] }
  0x34   : > { %853 = vmatpush.msra.mxu1 %v711_v36  ;;  %894 = vmatpush.msra.mxu2 %v712_v37  ;;  %v700_v29 = vunpack.c.l.bf16 %v665_v28  ;;  %v701_v30 = vunpack.c.h.bf16 %v665_v28  ;;  %v698_v34 = vunpack.c.l.bf16 %v664_v27  ;;  %v692_v36 = vunpack.c.l.bf16 %v661_v33 }
  0x35   : > { %812 = vmatpush.msra.mxu0 %v710_v35  ;;  %935 = vmatpush.msra.mxu3 %v713_v38  ;;  %v699_v35 = vunpack.c.h.bf16 %v664_v27  ;;  %v693_v37 = vunpack.c.h.bf16 %v661_v33  ;;  %v690_v38 = vunpack.c.l.bf16 %v660_v32  ;;  %v691_v39 = vunpack.c.h.bf16 %v660_v32 }
  0x36   : > { %854 = vmatpush.msra.mxu1 %v703_v42  ;;  %895 = vmatpush.msra.mxu2 %v704_v43 }
  0x37   : > { %2419 = vmatmul.msk.f32.gmra.mxu0 %vm5015_vm0, %v3084_v12  ;;  %936 = vmatpush.msra.mxu3 %v705_v44  ;;  %v3333_v44 = vld [vmem:[%s3214_s18 + $0x30] sm:$0xff] }
  0x38   : > { %2424 = vmatmul.msk.f32.gmra.mxu1 %vm5015_vm0, %v3084_v12  ;;  %2429 = vmatmul.msk.f32.gmra.mxu2 %vm5015_vm0, %v3084_v12 }
  0x39   : > { %2434 = vmatmul.msk.f32.gmra.mxu3 %vm5015_vm0, %v3084_v12  ;;  %813 = vmatpush.msra.mxu0 %v702_v41  ;;  %v3318_v41 = vld [vmem:[%s3214_s18 + $0x28] sm:$0xff] }
  0x3a   : > { %855 = vmatpush.msra.mxu1 %v695_v49  ;;  %896 = vmatpush.msra.mxu2 %v696_v51  ;;  %v3352_v49 = vld [vmem:[%s3214_s18 + $0x38] sm:$0xff] }
  0x3b   : > { %814 = vmatpush.msra.mxu0 %v694_v48  ;;  %937 = vmatpush.msra.mxu3 %v697_v52 }
  0x3c   : > { %856 = vmatpush.msra.mxu1 %v687_v54  ;;  %897 = vmatpush.msra.mxu2 %v688_v55 }
  0x3d   : > { %815 = vmatpush.msra.mxu0 %v686_v53  ;;  %938 = vmatpush.msra.mxu3 %v689_v56 }
  0x3e   : > { %2158 = vperm.xlu0 %2666, %v2152_v40  }
  0x3f   : > { %2420 = vmatmul.msk.f32.gmra.mxu0 %vm5015_vm0, %v3097_v13 }
  0x40   : > { %2425 = vmatmul.msk.f32.gmra.mxu1 %vm5015_vm0, %v3097_v13  ;;  %2430 = vmatmul.msk.f32.gmra.mxu2 %vm5015_vm0, %v3097_v13 }
  0x41   : > { %2435 = vmatmul.msk.f32.gmra.mxu3 %vm5015_vm0, %v3097_v13 }
  0x47   : > { %2421 = vmatmul.msk.f32.gmra.mxu0 %vm5015_vm0, %v3110_v14 }
  0x48   : > { %2426 = vmatmul.msk.f32.gmra.mxu1 %vm5015_vm0, %v3110_v14  ;;  %2431 = vmatmul.msk.f32.gmra.mxu2 %vm5015_vm0, %v3110_v14 }
  0x49   : > { %2436 = vmatmul.msk.f32.gmra.mxu3 %vm5015_vm0, %v3110_v14 }
  0x4f   : > { %2437 = vmatmul.msk.f32.vlgmr.msrb.gmra.mxu0 %vm5015_vm0, %v3055_v5 }
  0x50   : > { %2442 = vmatmul.msk.f32.vlgmr.msrb.gmra.mxu1 %vm5015_vm0, %v3055_v5  ;;  %2447 = vmatmul.msk.f32.vlgmr.msrb.gmra.mxu2 %vm5015_vm0, %v3055_v5 }
  0x51   : > { %2452 = vmatmul.msk.f32.vlgmr.msrb.gmra.mxu3 %vm5015_vm0, %v3055_v5  ;;  %2511 = vmatpush.msk.msrb.mxu2 %vm775_vm1, %v740_v58  ;;  %v677_v5 = vld [vmem:[%s4999_s6 + $0x98] sm:$0xff] }
  0x52   : > { %2520 = vmatpush.msk.msrb.mxu3 %vm775_vm1, %v741_v59  ;;  %2493 = vmatpush.msk.msrb.mxu0 %vm775_vm1, %v738_v2  ;;  %v724_v6 = vunpack.c.l.bf16 %v677_v5  ;;  %v725_v7 = vunpack.c.h.bf16 %v677_v5 }
  0x53   : > { %1056 = vmatpush.msrb.mxu2 %v732_v0  ;;  %2502 = vmatpush.msk.msrb.mxu1 %vm775_vm1, %v739_v3 }
  0x54   : > { %1097 = vmatpush.msrb.mxu3 %v733_v1  ;;  %974 = vmatpush.msrb.mxu0 %v730_v9 }
  0x55   : > { %1057 = vmatpush.msrb.mxu2 %v724_v6  ;;  %1015 = vmatpush.msrb.mxu1 %v731_v10 }
  0x56   : > { %1098 = vmatpush.msrb.mxu3 %v725_v7 }
  0x57   : > { %2438 = vmatmul.msk.f32.gmra.mxu0 %vm5015_vm0, %v3071_v11  ;;  %1058 = vmatpush.msrb.mxu2 %v716_v19 }
  0x58   : > { %2443 = vmatmul.msk.f32.gmra.mxu1 %vm5015_vm0, %v3071_v11  ;;  %2448 = vmatmul.msk.f32.gmra.mxu2 %vm5015_vm0, %v3071_v11 }
  0x59   : > { %2453 = vmatmul.msk.f32.gmra.mxu3 %vm5015_vm0, %v3071_v11  ;;  %v3266_v11 = vld [vmem:[%s3214_s18 + $0x18] sm:$0xff]  ;;  %1059 = vmatpush.msrb.mxu2 %v708_v25 }
  0x5a   : > { %1099 = vmatpush.msrb.mxu3 %v717_v20 }
  0x5b   : > { %1060 = vmatpush.msrb.mxu2 %v700_v29 }
  0x5c   : > { %1100 = vmatpush.msrb.mxu3 %v709_v26 }
  0x5d   : > { %1061 = vmatpush.msrb.mxu2 %v692_v36 }
  0x5e   : > { %1101 = vmatpush.msrb.mxu3 %v701_v30 }
  0x5f   : > { %2439 = vmatmul.msk.f32.gmra.mxu0 %vm5015_vm0, %v3084_v12 }
  0x60   : > { %2444 = vmatmul.msk.f32.gmra.mxu1 %vm5015_vm0, %v3084_v12  ;;  %2449 = vmatmul.msk.f32.gmra.mxu2 %vm5015_vm0, %v3084_v12 }
  0x61   : > { %2454 = vmatmul.msk.f32.gmra.mxu3 %vm5015_vm0, %v3084_v12  ;;  %v676_v12 = vld [vmem:[%s4999_s6 + $0x90] sm:$0xff] }
  0x62   : > { %1102 = vmatpush.msrb.mxu3 %v693_v37 }
  0x67   : > { %2440 = vmatmul.msk.f32.gmra.mxu0 %vm5015_vm0, %v3097_v13 }
  0x68   : > { %2445 = vmatmul.msk.f32.gmra.mxu1 %vm5015_vm0, %v3097_v13  ;;  %2450 = vmatmul.msk.f32.gmra.mxu2 %vm5015_vm0, %v3097_v13 }
  0x69   : > { %2455 = vmatmul.msk.f32.gmra.mxu3 %vm5015_vm0, %v3097_v13  ;;  %v722_v13 = vunpack.c.l.bf16 %v676_v12 }
  0x6b   : > { %975 = vmatpush.msrb.mxu0 %v722_v13 }
  0x6d   : > { %976 = vmatpush.msrb.mxu0 %v714_v17 }
  0x6f   : > { %2441 = vmatmul.msk.f32.gmra.mxu0 %vm5015_vm0, %v3110_v14 }
  0x70   : > { %2446 = vmatmul.msk.f32.gmra.mxu1 %vm5015_vm0, %v3110_v14  ;;  %2451 = vmatmul.msk.f32.gmra.mxu2 %vm5015_vm0, %v3110_v14 }
  0x71   : > { %2456 = vmatmul.msk.f32.gmra.mxu3 %vm5015_vm0, %v3110_v14  ;;  %v723_v14 = vunpack.c.h.bf16 %v676_v12  ;;  %977 = vmatpush.msrb.mxu0 %v706_v23 }
  0x73   : > { %1016 = vmatpush.msrb.mxu1 %v723_v14  ;;  %978 = vmatpush.msrb.mxu0 %v698_v34 }
  0x75   : > { %1017 = vmatpush.msrb.mxu1 %v715_v18  ;;  %979 = vmatpush.msrb.mxu0 %v690_v38 }
  0x77   : > { %2458 = vmatmul.msk.f32.vlgmr.msra.gmra.mxu0 %vm750_vm2, %v3219_v60  ;;  %1018 = vmatpush.msrb.mxu1 %v707_v24 }
  0x78   : > { %2467 = vmatmul.msk.f32.vlgmr.msra.gmra.mxu1 %vm750_vm2, %v3219_v60  ;;  %2476 = vmatmul.msk.f32.vlgmr.msra.gmra.mxu2 %vm750_vm2, %v3219_v60 }
  0x79   : > { %2485 = vmatmul.msk.f32.vlgmr.msra.gmra.mxu3 %vm750_vm2, %v3219_v60  ;;  %1019 = vmatpush.msrb.mxu1 %v699_v35 }
  0x7b   : > { %1020 = vmatpush.msrb.mxu1 %v691_v39 }
  0x7f   : > { %2459 = vmatmul.msk.f32.gmra.mxu0 %vm750_vm2, %v3230_v61 }
  0x80   : > { %2468 = vmatmul.msk.f32.gmra.mxu1 %vm750_vm2, %v3230_v61  ;;  %2477 = vmatmul.msk.f32.gmra.mxu2 %vm750_vm2, %v3230_v61 }
  0x81   : > { %2486 = vmatmul.msk.f32.gmra.mxu3 %vm750_vm2, %v3230_v61 }
  0x87   : > { %2460 = vmatmul.msk.f32.gmra.mxu0 %vm750_vm2, %v3247_v4 }
  0x88   : > { %2469 = vmatmul.msk.f32.gmra.mxu1 %vm750_vm2, %v3247_v4  ;;  %2478 = vmatmul.msk.f32.gmra.mxu2 %vm750_vm2, %v3247_v4 }
  0x89   : > { %2487 = vmatmul.msk.f32.gmra.mxu3 %vm750_vm2, %v3247_v4 }
  0x8f   : > { %2461 = vmatmul.msk.f32.gmra.mxu0 %vm750_vm2, %v3266_v11 }
  0x90   : > { %2470 = vmatmul.msk.f32.gmra.mxu1 %vm750_vm2, %v3266_v11  ;;  %2479 = vmatmul.msk.f32.gmra.mxu2 %vm750_vm2, %v3266_v11 }
  0x91   : > { %2488 = vmatmul.msk.f32.gmra.mxu3 %vm750_vm2, %v3266_v11 }
  0x97   : > { %2462 = vmatmul.msk.f32.gmra.mxu0 %vm750_vm2, %v3298_v31 }
  0x98   : > { %2471 = vmatmul.msk.f32.gmra.mxu1 %vm750_vm2, %v3298_v31  ;;  %2480 = vmatmul.msk.f32.gmra.mxu2 %vm750_vm2, %v3298_v31 }
  0x99   : > { %2489 = vmatmul.msk.f32.gmra.mxu3 %vm750_vm2, %v3298_v31 }
  0x9b   : > { %v3502_v26 = vpop.permute.xlu0 %647 }
  0x9f   : > { %2463 = vmatmul.msk.f32.gmra.mxu0 %vm750_vm2, %v3318_v41 }
  0xa0   : > { %2472 = vmatmul.msk.f32.gmra.mxu1 %vm750_vm2, %v3318_v41  ;;  %2481 = vmatmul.msk.f32.gmra.mxu2 %vm750_vm2, %v3318_v41 }
  0xa1   : > { %2490 = vmatmul.msk.f32.gmra.mxu3 %vm750_vm2, %v3318_v41 }
  0xa4   : > { %v3328_v42 = vpop.f32.mrf.mxu0 }
  0xa5   : > { %v3330_v43 = vpop.f32.mrf.mxu1  ;;  %v3506_v27 = vadd.f32 %v3502_v26, %v3328_v42 }
  0xa6   : > { %v3529_v40 = vadd.f32 %v3502_v26, %v3330_v43 }
  0xa7   : > { %2464 = vmatmul.msk.f32.gmra.mxu0 %vm750_vm2, %v3333_v44 }
  0xa8   : > { %2473 = vmatmul.msk.f32.gmra.mxu1 %vm750_vm2, %v3333_v44  ;;  %2482 = vmatmul.msk.f32.gmra.mxu2 %vm750_vm2, %v3333_v44 }
  0xa9   : > { %2491 = vmatmul.msk.f32.gmra.mxu3 %vm750_vm2, %v3333_v44 }
  0xab   : > { %v3343_v45 = vpop.f32.mrf.mxu2 }
  0xac   : > { %v3345_v46 = vpop.f32.mrf.mxu3  ;;  %v3347_v47 = vpop.f32.mrf.mxu0  ;;  %v3510_v28 = vadd.f32 %v3502_v26, %v3343_v45 }
  0xad   : > { %5020 = vst [vmem:[#allocation8_spill] sm:$0xff] %v3347_v47  ;;  %v3349_v48 = vpop.f32.mrf.mxu1  ;;  %v3514_v29 = vadd.f32 %v3502_v26, %v3345_v46 }
  0xae   : > { %5021 = vst [vmem:[#allocation9_spill] sm:$0xff] %v3349_v48 }
  0xaf   : > { %2465 = vmatmul.msk.f32.gmra.mxu0 %vm750_vm2, %v3352_v49 }
  0xb0   : > { %2474 = vmatmul.msk.f32.gmra.mxu1 %vm750_vm2, %v3352_v49  ;;  %2483 = vmatmul.msk.f32.gmra.mxu2 %vm750_vm2, %v3352_v49 }
  0xb1   : > { %2492 = vmatmul.msk.f32.gmra.mxu3 %vm750_vm2, %v3352_v49 }
  0xb3   : > { %v3362_v50 = vpop.f32.mrf.mxu2 }
  0xb4   : > { %5022 = vst [vmem:[#allocation10_spill] sm:$0xff] %v3362_v50  ;;  %v3364_v51 = vpop.f32.mrf.mxu3  ;;  %v3366_v52 = vpop.f32.mrf.mxu0 }
  0xb5   : > { %5023 = vst [vmem:[#allocation11_spill] sm:$0xff] %v3364_v51  ;;  %v3368_v53 = vpop.f32.mrf.mxu1 }
  0xb6   : > { %5024 = vst [vmem:[#allocation12_spill] sm:$0xff] %v3366_v52 }
  0xb7   : > { %5025 = vst [vmem:[#allocation13_spill] sm:$0xff] %v3368_v53  ;;  %2494 = vmatmul.msk.f32.vlgmr.msrb.gmra.mxu0 %vm750_vm2, %v3219_v60 }
  0xb8   : > { %2503 = vmatmul.msk.f32.vlgmr.msrb.gmra.mxu1 %vm750_vm2, %v3219_v60  ;;  %2512 = vmatmul.msk.f32.vlgmr.msrb.gmra.mxu2 %vm750_vm2, %v3219_v60 }
  0xb9   : > { %2521 = vmatmul.msk.f32.vlgmr.msrb.gmra.mxu3 %vm750_vm2, %v3219_v60 }
  0xbb   : > { %v3378_v54 = vpop.f32.mrf.mxu2 }
  0xbc   : > { %5026 = vst [vmem:[#allocation14_spill] sm:$0xff] %v3378_v54  ;;  %v3380_v55 = vpop.f32.mrf.mxu3  ;;  %v3382_v56 = vpop.f32.mrf.mxu0 }
  0xbd   : > { %5027 = vst [vmem:[#allocation15_spill] sm:$0xff] %v3380_v55  ;;  %v3384_v57 = vpop.f32.mrf.mxu1 }
  0xbe   : > { %5028 = vst [vmem:[#allocation16_spill] sm:$0xff] %v3382_v56 }
  0xbf   : > { %5029 = vst [vmem:[#allocation17_spill] sm:$0xff] %v3384_v57  ;;  %2495 = vmatmul.msk.f32.gmra.mxu0 %vm750_vm2, %v3230_v61 }
  0xc0   : > { %2504 = vmatmul.msk.f32.gmra.mxu1 %vm750_vm2, %v3230_v61  ;;  %2513 = vmatmul.msk.f32.gmra.mxu2 %vm750_vm2, %v3230_v61 }
  0xc1   : > { %2522 = vmatmul.msk.f32.gmra.mxu3 %vm750_vm2, %v3230_v61 }
  0xc3   : > { %v3394_v58 = vpop.f32.mrf.mxu2 }
  0xc4   : > { %5030 = vst [vmem:[#allocation18_spill] sm:$0xff] %v3394_v58  ;;  %v3396_v59 = vpop.f32.mrf.mxu3  ;;  %v3398_v60 = vpop.f32.mrf.mxu0 }
  0xc5   : > { %5031 = vst [vmem:[#allocation19_spill] sm:$0xff] %v3396_v59  ;;  %v3400_v62 = vpop.f32.mrf.mxu1 }
  0xc6   : > { %5032 = vst [vmem:[#allocation20_spill] sm:$0xff] %v3398_v60 }
  0xc7   : > { %5033 = vst [vmem:[#allocation21_spill] sm:$0xff] %v3400_v62  ;;  %2496 = vmatmul.msk.f32.gmra.mxu0 %vm750_vm2, %v3247_v4 }
  0xc8   : > { %2505 = vmatmul.msk.f32.gmra.mxu1 %vm750_vm2, %v3247_v4  ;;  %2514 = vmatmul.msk.f32.gmra.mxu2 %vm750_vm2, %v3247_v4 }
  0xc9   : > { %2523 = vmatmul.msk.f32.gmra.mxu3 %vm750_vm2, %v3247_v4 }
  0xcb   : > { %v3410_v61 = vpop.f32.mrf.mxu2 }
  0xcc   : > { %5034 = vst [vmem:[#allocation22_spill] sm:$0xff] %v3410_v61  ;;  %v3412_v63 = vpop.f32.mrf.mxu3  ;;  %v3414_v0 = vpop.f32.mrf.mxu0 }
  0xcd   : > { %5035 = vst [vmem:[#allocation23_spill] sm:$0xff] %v3412_v63  ;;  %v3416_v1 = vpop.f32.mrf.mxu1 }
  0xcf   : > { %2497 = vmatmul.msk.f32.gmra.mxu0 %vm750_vm2, %v3266_v11 }
  0xd0   : > { %2506 = vmatmul.msk.f32.gmra.mxu1 %vm750_vm2, %v3266_v11  ;;  %2515 = vmatmul.msk.f32.gmra.mxu2 %vm750_vm2, %v3266_v11 }
  0xd1   : > { %2524 = vmatmul.msk.f32.gmra.mxu3 %vm750_vm2, %v3266_v11 }
  0xd3   : > { %v3426_v2 = vpop.f32.mrf.mxu2 }
  0xd4   : > { %v3428_v3 = vpop.f32.mrf.mxu3  ;;  %v3430_v4 = vpop.f32.mrf.mxu0 }
  0xd5   : > { %5036 = vst [vmem:[#allocation24_spill] sm:$0xff] %v3430_v4  ;;  %v3432_v5 = vpop.f32.mrf.mxu1 }
  0xd6   : > { %5037 = vst [vmem:[#allocation25_spill] sm:$0xff] %v3432_v5 }
  0xd7   : > { %2498 = vmatmul.msk.f32.gmra.mxu0 %vm750_vm2, %v3298_v31 }
  0xd8   : > { %2507 = vmatmul.msk.f32.gmra.mxu1 %vm750_vm2, %v3298_v31  ;;  %2516 = vmatmul.msk.f32.gmra.mxu2 %vm750_vm2, %v3298_v31 }
  0xd9   : > { %2525 = vmatmul.msk.f32.gmra.mxu3 %vm750_vm2, %v3298_v31 }
  0xdb   : > { %v3442_v6 = vpop.f32.mrf.mxu2 }
  0xdc   : > { %5038 = vst [vmem:[#allocation26_spill] sm:$0xff] %v3442_v6  ;;  %v3444_v7 = vpop.f32.mrf.mxu3  ;;  %v3446_v8 = vpop.f32.mrf.mxu0 }
  0xdd   : > { %5039 = vst [vmem:[#allocation27_spill] sm:$0xff] %v3444_v7  ;;  %v3448_v9 = vpop.f32.mrf.mxu1 }
  0xde   : > { %5040 = vst [vmem:[#allocation28_spill] sm:$0xff] %v3446_v8 }
  0xdf   : > { %5041 = vst [vmem:[#allocation29_spill] sm:$0xff] %v3448_v9  ;;  %2499 = vmatmul.msk.f32.gmra.mxu0 %vm750_vm2, %v3318_v41 }
  0xe0   : > { %2508 = vmatmul.msk.f32.gmra.mxu1 %vm750_vm2, %v3318_v41  ;;  %2517 = vmatmul.msk.f32.gmra.mxu2 %vm750_vm2, %v3318_v41 }
  0xe1   : > { %2526 = vmatmul.msk.f32.gmra.mxu3 %vm750_vm2, %v3318_v41 }
  0xe3   : > { %v3458_v10 = vpop.f32.mrf.mxu2 }
  0xe4   : > { %5042 = vst [vmem:[#allocation30_spill] sm:$0xff] %v3458_v10  ;;  %v3460_v11 = vpop.f32.mrf.mxu3  ;;  %v3462_v12 = vpop.f32.mrf.mxu0 }
  0xe5   : > { %5043 = vst [vmem:[#allocation31_spill] sm:$0xff] %v3460_v11  ;;  %v3464_v13 = vpop.f32.mrf.mxu1 }
  0xe6   : > { %5044 = vst [vmem:[#allocation32_spill] sm:$0xff] %v3462_v12 }
  0xe7   : > { %5045 = vst [vmem:[#allocation33_spill] sm:$0xff] %v3464_v13  ;;  %2500 = vmatmul.msk.f32.gmra.mxu0 %vm750_vm2, %v3333_v44 }
  0xe8   : > { %2509 = vmatmul.msk.f32.gmra.mxu1 %vm750_vm2, %v3333_v44  ;;  %2518 = vmatmul.msk.f32.gmra.mxu2 %vm750_vm2, %v3333_v44 }
  0xe9   : > { %2527 = vmatmul.msk.f32.gmra.mxu3 %vm750_vm2, %v3333_v44 }
  0xeb   : > { %v3474_v14 = vpop.f32.mrf.mxu2 }
  0xec   : > { %5046 = vst [vmem:[#allocation34_spill] sm:$0xff] %v3474_v14  ;;  %v3476_v15 = vpop.f32.mrf.mxu3  ;;  %v3478_v16 = vpop.f32.mrf.mxu0 }
  0xed   : > { %5047 = vst [vmem:[#allocation35_spill] sm:$0xff] %v3476_v15  ;;  %v3480_v17 = vpop.f32.mrf.mxu1 }
  0xee   : > { %5048 = vst [vmem:[#allocation36_spill] sm:$0xff] %v3478_v16 }
  0xef   : > { %5049 = vst [vmem:[#allocation37_spill] sm:$0xff] %v3480_v17  ;;  %2501 = vmatmul.msk.f32.gmra.mxu0 %vm750_vm2, %v3352_v49 }
  0xf0   : > { %2510 = vmatmul.msk.f32.gmra.mxu1 %vm750_vm2, %v3352_v49  ;;  %2519 = vmatmul.msk.f32.gmra.mxu2 %vm750_vm2, %v3352_v49 }
  0xf1   : > { %2528 = vmatmul.msk.f32.gmra.mxu3 %vm750_vm2, %v3352_v49 }
  0xf3   : > { %v3490_v18 = vpop.f32.mrf.mxu2 }
  0xf4   : > { %5050 = vst [vmem:[#allocation38_spill] sm:$0xff] %v3490_v18  ;;  %v3492_v19 = vpop.f32.mrf.mxu3  ;;  %v3494_v20 = vpop.f32.mrf.mxu0 }
  0xf5   : > { %5051 = vst [vmem:[#allocation39_spill] sm:$0xff] %v3492_v19  ;;  %v3496_v21 = vpop.f32.mrf.mxu1 }
  0xfb   : > { %v3498_v22 = vpop.f32.mrf.mxu2 }
  0xfc   : > { %5052 = vst [vmem:[#allocation40_spill] sm:$0xff] %v3498_v22  ;;  %v3500_v23 = vpop.f32.mrf.mxu3  ;;  %v820_v24 = vpop.f32.mrf.mxu0 }
  0xfd   : > { %5053 = vst [vmem:[#allocation41_spill] sm:$0xff] %v3500_v23  ;;  %v861_v25 = vpop.f32.mrf.mxu1  ;;  %v1128_v30 = vsub.f32 %v3506_v27, %v820_v24 }
  0xfe   : > { %v1129_v45 = vsub.f32 %v3529_v40, %v861_v25 }
  0xff   : > { %v2529_v37 = vmul.f32 -1.442695, %v1128_v30 }
 0x100   : > { %v2530_v24 = vmul.f32 -1.442695, %v1129_v45 }
 0x101   : > { %2669 = vpow2.f32 %v2529_v37 }
 0x103   : > { %v902_v31 = vpop.f32.mrf.mxu2 }
 0x104   : > { %v943_v32 = vpop.f32.mrf.mxu3  ;;  %v1130_v33 = vsub.f32 %v3510_v28, %v902_v31  ;;  %v3519_v35 = vpop.f32.mrf.mxu0 }
 0x105   : > { %v1131_v34 = vsub.f32 %v3514_v29, %v943_v32  ;;  %v3521_v36 = vpop.f32.mrf.mxu1 }
 0x106   : > { %v2531_v25 = vmul.f32 -1.442695, %v1130_v33 }
 0x107   : > { %v2670_v46 = vpop.eup %2669 }
 0x108   : > { %v3533_v32 = vadd.f32 1.0, %v2670_v46  ;;  %v2532_v46 = vmul.f32 -1.442695, %v1131_v34 }
 0x10a   : > { %vm1173_vm7 = vweird.f32 %v3533_v32  ;;  %v1177_v58 = vand.u32 2147483647, %v3533_v32 }
 0x10b   : > { %v3523_v38 = vpop.f32.mrf.mxu2 }
 0x10c   : > { %5054 = vst [vmem:[#allocation42_spill] sm:$0xff] %v3523_v38  ;;  %v3525_v39 = vpop.f32.mrf.mxu3  ;;  %v826_v41 = vpop.f32.mrf.mxu0  ;;  %vm1178_vm10 = vcmp.eq.f32.partialorder %v1177_v58, 8.507059e+37  ;;  %v3653_v58 = vadd.f32 %v3502_v26, %v3428_v3 }
 0x10d   : > { %5055 = vst [vmem:[#allocation43_spill] sm:$0xff] %v3525_v39  ;;  %v867_v42 = vpop.f32.mrf.mxu1  ;;  %v1312_v44 = vsub.f32 %v3506_v27, %v826_v41 }
 0x10e   : > { %v1313_v37 = vsub.f32 %v3529_v40, %v867_v42 }
 0x10f   : > { %v2537_v49 = vmul.f32 -1.442695, %v1312_v44 }
 0x110   : > { %v2538_v43 = vmul.f32 -1.442695, %v1313_v37 }
 0x111   : > { %2671 = vpow2.f32 %v2537_v49 }
 0x112   : > { %2673 = vpow2.f32 %v2530_v24 }
 0x113   : > { %v908_v31 = vpop.f32.mrf.mxu2  ;;  %2675 = vrcp.f32 %v3533_v32 }
 0x114   : > { %v949_v30 = vpop.f32.mrf.mxu3  ;;  %v3536_v19 = vpop.f32.mrf.mxu0  ;;  %2677 = vpow2.f32 %v2538_v43  ;;  %v1314_v12 = vsub.f32 %v3510_v28, %v908_v31 }
 0x115   : > { %v3538_v18 = vpop.f32.mrf.mxu1  ;;  %v1315_v8 = vsub.f32 %v3514_v29, %v949_v30 }
 0x117   : > { %v2672_v41 = vpop.eup %2671 }
 0x118   : > { %v2674_v45 = vpop.eup %2673  ;;  %v3545_v14 = vadd.f32 1.0, %v2672_v41 }
 0x119   : > { %v3549_v17 = vpop.eup %2675  ;;  %v3552_v49 = vadd.f32 1.0, %v2674_v45 }
 0x11a   : > { %2679 = vrcp.f32 %v3545_v14  ;;  %v1169_v33 = vmul.f32 %v3549_v17, %v3533_v32  ;;  %v2678_v24 = vpop.eup %2677  ;;  %vm1174_vm3 = vweird.f32 %v3549_v17  ;;  %vm1357_vm5 = vweird.f32 %v3545_v14 }
 0x11b   : > { %v3541_v15 = vpop.f32.mrf.mxu2  ;;  %2681 = vpow2.f32 %v2531_v25  ;;  %v3567_v7 = vadd.f32 1.0, %v2678_v24  ;;  %v2539_v24 = vmul.f32 -1.442695, %v1314_v12  ;;  %vm3611_vm8 = vmor %vm1173_vm7, %vm1174_vm3  ;;  %v1192_v3 = vand.u32 2147483647, %v3552_v49 }
 0x11c   : > { %5056 = vst [vmem:[#allocation44_spill] sm:$0xff] %v3541_v15  ;;  %v3543_v44 = vpop.f32.mrf.mxu3  ;;  %v832_v42 = vpop.f32.mrf.mxu0  ;;  %2683 = vpow2.f32 %v2532_v46  ;;  %v1170_v25 = vsub.f32 1.0, %v1169_v33  ;;  %vm1188_vm11 = vweird.f32 %v3552_v49 }
 0x11d   : > { %5057 = vst [vmem:[#allocation45_spill] sm:$0xff] %v3543_v44  ;;  %v3547_v11 = vpop.f32.mrf.mxu1  ;;  %2685 = vrcp.f32 %v3552_v49  ;;  %v1496_v34 = vsub.f32 %v3506_v27, %v832_v42  ;;  %vm3682_vm13 = vcmp.eq.f32.partialorder %v1192_v3, 8.507059e+37  ;;  %vm1372_vm1 = vweird.f32 %v3567_v7 }
 0x11e   : > { %v1171_v63 = vmul.f32 %v3549_v17, %v1170_v25  ;;  %2687 = vrcp.f32 %v3567_v7 }
 0x11f   : > { %v2545_v42 = vmul.f32 -1.442695, %v1496_v34 }
 0x120   : > { %v2680_v41 = vpop.eup %2679  ;;  %v1172_v12 = vadd.f32 %v3549_v17, %v1171_v63 }
 0x121   : > { %v2682_v45 = vpop.eup %2681  ;;  %v1353_v46 = vmul.f32 %v2680_v41, %v3545_v14  ;;  %vm1358_vm4 = vweird.f32 %v2680_v41  ;;  %2689 = vpow2.f32 %v2545_v42  ;;  %v1179_v42 = vand.u32 2147483648, %v3533_v32 }
 0x122   : > { %v2684_v13 = vpop.eup %2683  ;;  %v3570_v9 = vadd.f32 1.0, %v2682_v45  ;;  %vm3596_vm6 = vmor %vm1357_vm5, %vm1358_vm4  ;;  %v1176_v32 = vsel %vm3611_vm8, %v3549_v17, %v1172_v12 }
 0x123   : > { %v3558_v37 = vpop.f32.mrf.mxu2  ;;  %v1354_v6 = vsub.f32 1.0, %v1353_v46  ;;  %v3573_v5 = vpop.eup %2685  ;;  %v3576_v4 = vadd.f32 1.0, %v2684_v13  ;;  %v1363_v13 = vand.u32 2147483648, %v3545_v14  ;;  %v1361_v46 = vand.u32 2147483647, %v3545_v14 }
 0x124   : > { %v3560_v43 = vpop.f32.mrf.mxu3  ;;  %v3562_v16 = vpop.f32.mrf.mxu0  ;;  %v1184_v30 = vmul.f32 %v3573_v5, %v3552_v49  ;;  %2691 = vrcp.f32 %v3570_v9  ;;  %vm1189_vm12 = vweird.f32 %v3573_v5  ;;  %v1209_v53 = vand.u32 2147483648, %v3570_v9 }
 0x125   : > { %v3564_v10 = vpop.f32.mrf.mxu1  ;;  %v1355_v33 = vmul.f32 %v2680_v41, %v1354_v6  ;;  %v2540_v6 = vmul.f32 -1.442695, %v1315_v8  ;;  %2693 = vrcp.f32 %v3576_v4  ;;  %v1497_v8 = vsub.f32 %v3529_v40, %v3547_v11  ;;  %v3603_v63 = vpop.eup %2687  ;;  %vm3696_vm14 = vmor %vm1188_vm11, %vm1189_vm12 }
 0x126   : > { %5058 = vst [vmem:[#allocation46_spill] sm:$0xff] %v3564_v10  ;;  %2695 = vpow2.f32 %v2539_v24  ;;  %v1185_v24 = vsub.f32 1.0, %v1184_v30  ;;  %v1364_v54 = vor.u32 1.1754944e-38, %v1363_v13  ;;  %vm1362_vm9 = vcmp.eq.f32.partialorder %v1361_v46, 8.507059e+37 }
 0x127   : > { %v1356_v61 = vadd.f32 %v2680_v41, %v1355_v33  ;;  %2697 = vpow2.f32 %v2540_v6  ;;  %v2690_v11 = vpop.eup %2689  ;;  %v1368_v33 = vmul.f32 %v3603_v63, %v3567_v7  ;;  %v2546_v51 = vmul.f32 -1.442695, %v1497_v8 }
 0x128   : > { %v3630_v6 = vadd.f32 %v3502_v26, %v3414_v0  ;;  %v1186_v12 = vmul.f32 %v3573_v5, %v1185_v24  ;;  %v3645_v46 = vadd.f32 1.0, %v2690_v11  ;;  %vm1373_vm15 = vweird.f32 %v3603_v63 }
 0x129   : > { %v1360_v14 = vsel %vm3596_vm6, %v2680_v41, %v1356_v61  ;;  %v1180_v41 = vor.u32 1.1754944e-38, %v1179_v42  ;;  %v1369_v11 = vsub.f32 1.0, %v1368_v33  ;;  %vm3733_vm2 = vmor %vm1372_vm1, %vm1373_vm15 }
 0x12a   : > { %v3620_v61 = vpop.eup %2691  ;;  %v3624_v30 = vsel %vm1362_vm9, %v1364_v54, %v1360_v14  ;;  %v3642_v54 = vadd.f32 %v3502_v26, %v3426_v2  ;;  %vm1541_vm4 = vweird.f32 %v3645_v46 }
 0x12b   : > { %v3580_v31 = vpop.f32.mrf.mxu2  ;;  %v3626_v13 = vpop.eup %2693  ;;  %v3649_v42 = vsel %vm1178_vm10, %v1180_v41, %v1176_v32  ;;  %v1480_v2 = vmul.f32 %v3624_v30, %v3519_v35  ;;  %v1370_v50 = vmul.f32 %v3603_v63, %v1369_v11 }
 0x12c   : > { %5059 = vst [vmem:[#allocation47_spill] sm:$0xff] %v3580_v31  ;;  %v3582_v34 = vpop.f32.mrf.mxu3  ;;  %v838_v45 = vpop.f32.mrf.mxu0  ;;  %v1214_v24 = vmul.f32 %v3626_v13, %v3576_v4  ;;  %v1296_v35 = vmul.f32 %v3649_v42, %v3494_v20 }
 0x12d   : > { %5060 = vst [vmem:[#allocation48_spill] sm:$0xff] %v3582_v34  ;;  %v3588_v25 = vpop.f32.mrf.mxu1  ;;  %v1680_v59 = vsub.f32 %v3506_v27, %v838_v45  ;;  %v1498_v27 = vsub.f32 %v3510_v28, %v3558_v37  ;;  %v2696_v37 = vpop.eup %2695  ;;  %v1371_v11 = vadd.f32 %v3603_v63, %v1370_v50  ;;  %v1472_v34 = vadd.f32 %v3624_v30, %v3649_v42 }
 0x12e   : > { %v2698_v14 = vpop.eup %2697  ;;  %v3667_v41 = vadd.f32 1.0, %v2696_v37  ;;  %v3677_v62 = vadd.f32 %v1480_v2, %v1296_v35  ;;  %v1215_v37 = vsub.f32 1.0, %v1214_v24  ;;  %v1378_v24 = vand.u32 2147483648, %v3567_v7 }
 0x12f   : > { %v2553_v45 = vmul.f32 -1.442695, %v1680_v59  ;;  %v3634_v59 = vadd.f32 %v3502_v26, %v3416_v1  ;;  %v1199_v1 = vmul.f32 %v3620_v61, %v3570_v9  ;;  %v2547_v8 = vmul.f32 -1.442695, %v1498_v27 }
 0x130   : > { %v1194_v26 = vand.u32 2147483648, %v3552_v49  ;;  %v1187_v27 = vadd.f32 %v3573_v5, %v1186_v12  ;;  %v3675_v33 = vadd.f32 1.0, %v2698_v14  ;;  %v1375_v48 = vsel %vm3733_vm2, %v3603_v63, %v1371_v11 }
 0x131   : > { %2699 = vpow2.f32 %v2553_v45  ;;  %v1499_v45 = vsub.f32 %v3514_v29, %v3560_v43  ;;  %v1200_v43 = vsub.f32 1.0, %v1199_v1 }
 0x132   : > { %2701 = vpow2.f32 %v2546_v51  ;;  %v1195_v60 = vor.u32 1.1754944e-38, %v1194_v26  ;;  %v1224_v26 = vand.u32 2147483648, %v3576_v4  ;;  %v1191_v49 = vsel %vm3696_vm14, %v3573_v5, %v1187_v27 }
 0x133   : > { %v3636_v55 = vpop.f32.mrf.mxu2  ;;  %2703 = vrcp.f32 %v3645_v46  ;;  %v2548_v57 = vmul.f32 -1.442695, %v1499_v45  ;;  %v1681_v45 = vsub.f32 %v3529_v40, %v3588_v25  ;;  %v1201_v3 = vmul.f32 %v3620_v61, %v1200_v43 }
 0x134   : > { %v3638_v17 = vpop.f32.mrf.mxu3  ;;  %v3647_v0 = vpop.f32.mrf.mxu0  ;;  %2705 = vpow2.f32 %v2547_v8  ;;  %v3716_v43 = vor.u32 1.1754944e-38, %v1209_v53  ;;  %v1682_v5 = vsub.f32 %v3510_v28, %v3636_v55  ;;  %v1376_v27 = vand.u32 2147483647, %v3567_v7 }
 0x135   : > { %5065 = vst [vmem:[#allocation49_spill] sm:$0xff] %v3647_v0  ;;  %v3663_v32 = vpop.f32.mrf.mxu1  ;;  %2707 = vrcp.f32 %v3667_v41  ;;  %v1683_v50 = vsub.f32 %v3514_v29, %v3638_v17  ;;  %v3729_v53 = vor.u32 1.1754944e-38, %v1224_v26  ;;  %v3742_v55 = vsel %vm3682_vm13, %v1195_v60, %v1191_v49 }
 0x136   : > { %5066 = vst [vmem:[#allocation50_spill] sm:$0xff] %v3663_v32  ;;  %v3747_v17 = vadd.f32 %v3620_v61, %v1201_v3  ;;  %v2555_v12 = vmul.f32 -1.442695, %v1682_v5  ;;  %vm1377_vm3 = vcmp.eq.f32.partialorder %v1376_v27, 8.507059e+37 }
 0x137   : > { %v2700_v51 = vpop.eup %2699  ;;  %5073 = vst [vmem:[#allocation53_spill] sm:$0xff] %v3729_v53 }
 0x138   : > { %v3680_v20 = vadd.f32 1.0, %v2700_v51  ;;  %v2702_v2 = vpop.eup %2701  ;;  %v1216_v51 = vmul.f32 %v3626_v13, %v1215_v37  ;;  %v2554_v37 = vmul.f32 -1.442695, %v1681_v45 }
 0x139   : > { %v3711_v35 = vpop.eup %2703  ;;  %v3719_v56 = vadd.f32 1.0, %v2702_v2 }
 0x13a   : > { %2709 = vrcp.f32 %v3680_v20  ;;  %v2706_v25 = vpop.eup %2705  ;;  %v1537_v28 = vmul.f32 %v3711_v35, %v3645_v46  ;;  %v3750_v45 = vadd.f32 %v3626_v13, %v1216_v51  ;;  %vm1542_vm5 = vweird.f32 %v3711_v35 }
 0x13b   : > { %v3688_v1 = vpop.f32.mrf.mxu2  ;;  %2711 = vrcp.f32 %v3675_v33  ;;  %v3727_v14 = vpop.eup %2707  ;;  %v3752_v26 = vadd.f32 1.0, %v2706_v25  ;;  %v2556_v25 = vmul.f32 -1.442695, %v1683_v50  ;;  %vm3823_vm7 = vmor %vm1541_vm4, %vm1542_vm5  ;;  %vm1725_vm8 = vweird.f32 %v3680_v20 }
 0x13c   : > { %5069 = vst [vmem:[#allocation51_spill] sm:$0xff] %v3688_v1  ;;  %v3690_v8 = vpop.f32.mrf.mxu3  ;;  %2713 = vpow2.f32 %v2548_v57  ;;  %v984_v40 = vpop.f32.mrf.mxu0  ;;  %v1383_v51 = vmul.f32 %v3727_v14, %v3667_v41  ;;  %v1538_v2 = vsub.f32 1.0, %v1537_v28  ;;  %vm1556_vm13 = vweird.f32 %v3719_v56 }
 0x13d   : > { %5070 = vst [vmem:[#allocation52_spill] sm:$0xff] %v3690_v8  ;;  %v1025_v57 = vpop.f32.mrf.mxu1  ;;  %v1132_v7 = vsub.f32 %v3630_v6, %v984_v40  ;;  %v1379_v40 = vor.u32 1.1754944e-38, %v1378_v24  ;;  %2715 = vrcp.f32 %v3719_v56  ;;  %v1393_v8 = vand.u32 2147483648, %v3667_v41 }
 0x13e   : > { %5076 = vst [vmem:[#allocation54_spill] sm:$0xff] %v3750_v45  ;;  %2717 = vpow2.f32 %v2554_v37  ;;  %v1133_v11 = vsub.f32 %v3634_v59, %v1025_v57  ;;  %v1384_v28 = vsub.f32 1.0, %v1383_v51  ;;  %v1408_v57 = vand.u32 2147483648, %v3675_v33 }
 0x13f   : > { %v2533_v63 = vmul.f32 -1.442695, %v1132_v7  ;;  %v3765_v24 = vsel %vm1377_vm3, %v1379_v40, %v1375_v48  ;;  %2719 = vrcp.f32 %v3752_v26  ;;  %vm1204_vm3 = vweird.f32 %v3620_v61 }
 0x140   : > { %v3744_v29 = vpop.eup %2709  ;;  %2721 = vpow2.f32 %v2555_v12  ;;  %v1481_v7 = vmul.f32 %v3765_v24, %v3521_v36  ;;  %vm1388_vm4 = vweird.f32 %v3727_v14  ;;  %vm1203_vm5 = vweird.f32 %v3570_v9 }
 0x141   : > { %v3757_v52 = vpop.eup %2711  ;;  %v1721_v60 = vmul.f32 %v3744_v29, %v3680_v20  ;;  %2723 = vpow2.f32 %v2556_v25  ;;  %v1297_v25 = vmul.f32 %v3742_v55, %v3496_v21  ;;  %vm1726_vm6 = vweird.f32 %v3744_v29 }
 0x142   : > { %v2714_v49 = vpop.eup %2713  ;;  %v1398_v5 = vmul.f32 %v3757_v52, %v3675_v33  ;;  %2725 = vpow2.f32 %v2533_v63  ;;  %v1385_v63 = vmul.f32 %v3727_v14, %v1384_v28  ;;  %v1545_v28 = vand.u32 2147483647, %v3645_v46  ;;  %vm3848_vm10 = vmor %vm1725_vm8, %vm1726_vm6 }
 0x143   : > { %v1066_v3 = vpop.f32.mrf.mxu2  ;;  %v3772_v1 = vadd.f32 1.0, %v2714_v49  ;;  %v1722_v37 = vsub.f32 1.0, %v1721_v60  ;;  %v3780_v40 = vpop.eup %2715  ;;  %v2534_v60 = vmul.f32 -1.442695, %v1133_v11  ;;  %v3796_v11 = vor.u32 1.1754944e-38, %v1408_v57 }
 0x144   : > { %v1107_v47 = vpop.f32.mrf.mxu3  ;;  %v1134_v27 = vsub.f32 %v3642_v54, %v1066_v3  ;;  %v3776_v48 = vpop.f32.mrf.mxu0  ;;  %v1539_v3 = vmul.f32 %v3711_v35, %v1538_v2  ;;  %v1399_v49 = vsub.f32 1.0, %v1398_v5  ;;  %v3799_v5 = vadd.f32 %v1481_v7, %v1297_v25 }
 0x145   : > { %5077 = vst [vmem:[#allocation55_spill] sm:$0xff] %v3772_v1  ;;  %v1135_v50 = vsub.f32 %v3653_v58, %v1107_v47  ;;  %v2718_v12 = vpop.eup %2717  ;;  %v3785_v0 = vpop.f32.mrf.mxu1  ;;  %2727 = vrcp.f32 %v3772_v1  ;;  %v1723_v36 = vmul.f32 %v3744_v29, %v1722_v37  ;;  %v1547_v57 = vand.u32 2147483648, %v3645_v46 }
 0x146   : > { %5078 = vst [vmem:[#allocation56_spill] sm:$0xff] %v3776_v48  ;;  %v2535_v51 = vmul.f32 -1.442695, %v1134_v27  ;;  %v3789_v48 = vor.u32 1.1754944e-38, %v1393_v8  ;;  %v3793_v2 = vpop.eup %2719  ;;  %v1540_v21 = vadd.f32 %v3711_v35, %v1539_v3  ;;  %v3803_v8 = vadd.f32 1.0, %v2718_v12 }
 0x147   : > { %5079 = vst [vmem:[#allocation57_spill] sm:$0xff] %v3785_v0  ;;  %v2536_v32 = vmul.f32 -1.442695, %v1135_v50  ;;  %v2722_v27 = vpop.eup %2721  ;;  %2729 = vpow2.f32 %v2534_v60  ;;  %v1400_v47 = vmul.f32 %v3757_v52, %v1399_v49  ;;  %v1552_v25 = vmul.f32 %v3780_v40, %v3719_v56 }
 0x148   : > { %5080 = vst [vmem:[#allocation58_spill] sm:$0xff] %v3789_v48  ;;  %v2724_v50 = vpop.eup %2723  ;;  %2731 = vpow2.f32 %v2535_v51  ;;  %v1724_v60 = vadd.f32 %v3744_v29, %v1723_v36  ;;  %v3817_v12 = vadd.f32 %v3727_v14, %v1385_v63  ;;  %v1731_v51 = vand.u32 2147483648, %v3680_v20 }
 0x149   : > { %5081 = vst [vmem:[#allocation59_spill] sm:$0xff] %v3796_v11  ;;  %v2726_v7 = vpop.eup %2725  ;;  %2733 = vpow2.f32 %v2536_v32  ;;  %v3829_v32 = vadd.f32 1.0, %v2722_v27  ;;  %v3834_v36 = vadd.f32 1.0, %v2724_v50  ;;  %v1544_v46 = vsel %vm3823_vm7, %v3711_v35, %v1540_v21 }
 0x14a   : > { %5084 = vst [vmem:[#allocation62_spill] sm:$0xff] %v3817_v12  ;;  %2735 = vrcp.f32 %v3803_v8  ;;  %v1729_v63 = vand.u32 2147483647, %v3680_v20  ;;  %vm3840_vm9 = vcmp.eq.f32.partialorder %v1545_v28, 8.507059e+37  ;;  %v1548_v0 = vor.u32 1.1754944e-38, %v1547_v57 }
 0x14b   : > { %v3805_v37 = vpop.f32.mrf.mxu2  ;;  %5087 = vst [vmem:[#allocation63_spill] sm:$0xff] %v3834_v36  ;;  %v1567_v27 = vmul.f32 %v3793_v2, %v3752_v26  ;;  %v3852_v50 = vadd.f32 1.0, %v2726_v7  ;;  %v3855_v20 = vadd.f32 %v3757_v52, %v1400_v47  ;;  %v1553_v21 = vsub.f32 1.0, %v1552_v25 }
 0x14c   : > { %5082 = vst [vmem:[#allocation60_spill] sm:$0xff] %v3805_v37  ;;  %v3813_v3 = vpop.f32.mrf.mxu3  ;;  %v990_v49 = vpop.f32.mrf.mxu0  ;;  %v1562_v28 = vand.u32 2147483648, %v3719_v56  ;;  %v1728_v57 = vsel %vm3848_vm10, %v3744_v29, %v1724_v60  ;;  %v1732_v23 = vor.u32 1.1754944e-38, %v1731_v51  ;;  %2737 = vrcp.f32 %v3829_v32 }
 0x14d   : > { %5083 = vst [vmem:[#allocation61_spill] sm:$0xff] %v3813_v3  ;;  %v3831_v3 = vpop.eup %2727  ;;  %v1031_v7 = vpop.f32.mrf.mxu1  ;;  %v1549_v11 = vsel %vm3840_vm9, %v1548_v0, %v1544_v46  ;;  %v1560_v25 = vand.u32 2147483647, %v3719_v56  ;;  %2739 = vrcp.f32 %v3834_v36  ;;  %vm1730_vm11 = vcmp.eq.f32.partialorder %v1729_v63, 8.507059e+37 }
 0x14e   : > { %5092 = vst [vmem:[#allocation64_spill] sm:$0xff] %v3852_v50  ;;  %v2730_v35 = vpop.eup %2729  ;;  %v1582_v39 = vmul.f32 %v3831_v3, %v3772_v1  ;;  %v1568_v29 = vsub.f32 1.0, %v1567_v27  ;;  %2741 = vrcp.f32 %v3852_v50  ;;  %v3873_v51 = vsel %vm1730_vm11, %v1732_v23, %v1728_v57 }
 0x14f   : > { %5093 = vst [vmem:[#allocation65_spill] sm:$0xff] %v3855_v20  ;;  %v2732_v44 = vpop.eup %2731  ;;  %v3871_v60 = vadd.f32 1.0, %v2730_v35  ;;  %v1577_v0 = vand.u32 2147483648, %v3752_v26  ;;  %v1592_v37 = vand.u32 2147483648, %v3772_v1  ;;  %v1656_v45 = vadd.f32 %v1549_v11, %v1472_v34 }
 0x150   : > { %v2734_v47 = vpop.eup %2733  ;;  %v3879_v46 = vadd.f32 1.0, %v2732_v44  ;;  %v1554_v30 = vmul.f32 %v3780_v40, %v1553_v21  ;;  %v3884_v42 = vor.u32 1.1754944e-38, %v1562_v28  ;;  %v1583_v63 = vsub.f32 1.0, %v1582_v39 }
 0x151   : > { %5094 = vst [vmem:[#allocation66_spill] sm:$0xff] %v3871_v60  ;;  %v3875_v53 = vpop.eup %2735  ;;  %v3886_v27 = vadd.f32 1.0, %v2734_v47  ;;  %v1316_v57 = vsub.f32 %v3630_v6, %v990_v49  ;;  %v3894_v44 = vadd.f32 %v3873_v51, %v1656_v45  ;;  %v1569_v21 = vmul.f32 %v3793_v2, %v1568_v29 }
 0x152   : > { %5095 = vst [vmem:[#allocation67_spill] sm:$0xff] %v3879_v46  ;;  %v3896_v10 = vpop.eup %2737  ;;  %v1736_v39 = vmul.f32 %v3875_v53, %v3803_v8  ;;  %2743 = vrcp.f32 %v3871_v60  ;;  %v1317_v28 = vsub.f32 %v3634_v59, %v1031_v7  ;;  %vm1557_vm12 = vweird.f32 %v3780_v40 }
 0x153   : > { %v3881_v20 = vpop.f32.mrf.mxu2  ;;  %5096 = vst [vmem:[#allocation68_spill] sm:$0xff] %v3886_v27  ;;  %v3903_v47 = vpop.eup %2739  ;;  %v3906_v49 = vor.u32 1.1754944e-38, %v1577_v0  ;;  %v3908_v34 = vor.u32 1.1754944e-38, %v1592_v37  ;;  %2745 = vrcp.f32 %v3879_v46  ;;  %v3914_v29 = vadd.f32 %v3780_v40, %v1554_v30  ;;  %vm3994_vm2 = vmor %vm1556_vm13, %vm1557_vm12 }
 0x154   : > { %v3891_v31 = vpop.f32.mrf.mxu3  ;;  %v3911_v45 = vpop.eup %2741  ;;  %v1584_v35 = vmul.f32 %v3831_v3, %v1583_v63  ;;  %v1746_v23 = vand.u32 2147483648, %v3803_v8  ;;  %2747 = vrcp.f32 %v3886_v27  ;;  %v1751_v0 = vmul.f32 %v3896_v10, %v3829_v32 }
 0x155   : > { %5097 = vst [vmem:[#allocation69_spill] sm:$0xff] %v3906_v49  ;;  %v3919_v7 = vpop.f32.mrf.mxu0  ;;  %v2541_v37 = vmul.f32 -1.442695, %v1316_v57  ;;  %2749 = vrcp.f32 %v3894_v44  ;;  %v3927_v30 = vadd.f32 %v3793_v2, %v1569_v21  ;;  %v1737_v63 = vsub.f32 1.0, %v1736_v39  ;;  %v3930_v38 = vpop.f32.mrf.mxu1 }
 0x156   : > { %5098 = vst [vmem:[#allocation70_spill] sm:$0xff] %v3908_v34  ;;  %v1664_v34 = vmul.f32 %v1549_v11, %v3536_v19  ;;  %v1761_v15 = vand.u32 2147483648, %v3829_v32  ;;  %v2542_v22 = vmul.f32 -1.442695, %v1317_v28  ;;  %v1776_v1 = vand.u32 2147483648, %v3834_v36 }
 0x157   : > { %5099 = vst [vmem:[#allocation71_spill] sm:$0xff] %v3919_v7  ;;  %v1766_v7 = vmul.f32 %v3903_v47, %v3834_v36  ;;  %v1229_v57 = vmul.f32 %v3911_v45, %v3852_v50  ;;  %v1239_v19 = vand.u32 2147483648, %v3852_v50  ;;  %v3941_v21 = vadd.f32 %v3831_v3, %v1584_v35 }
 0x158   : > { %5100 = vst [vmem:[#allocation72_spill] sm:$0xff] %v3927_v30  ;;  %v3938_v11 = vpop.eup %2743  ;;  %v3943_v39 = vor.u32 1.1754944e-38, %v1746_v23  ;;  %v1318_v28 = vsub.f32 %v3642_v54, %v3881_v20  ;;  %vm3953_vm14 = vcmp.eq.f32.partialorder %v1560_v25, 8.507059e+37  ;;  %vm1741_vm15 = vweird.f32 %v3875_v53 }
 0x159   : > { %5101 = vst [vmem:[#allocation73_spill] sm:$0xff] %v3930_v38  ;;  %v3949_v38 = vadd.f32 %v3765_v24, %v3742_v55  ;;  %v3951_v36 = vpop.eup %2745  ;;  %v1752_v48 = vsub.f32 1.0, %v1751_v0  ;;  %v1254_v35 = vand.u32 2147483648, %v3871_v60  ;;  %2751 = vpow2.f32 %v2541_v37 }
 0x15a   : > { %5102 = vst [vmem:[#allocation74_spill] sm:$0xff] %v3941_v21  ;;  %v1672_v20 = vadd.f32 %v1664_v34, %v3677_v62  ;;  %v3962_v21 = vpop.eup %2747  ;;  %v1738_v55 = vmul.f32 %v3875_v53, %v1737_v63  ;;  %v3965_v24 = vor.u32 1.1754944e-38, %v1761_v15  ;;  %2753 = vpow2.f32 %v2542_v22 }
 0x15b   : > { %v3959_v23 = vpop.f32.mrf.mxu2  ;;  %v3968_v30 = vpop.eup %2749  ;;  %vm1740_vm1 = vweird.f32 %v3803_v8  ;;  %v1767_v0 = vsub.f32 1.0, %v1766_v7  ;;  %v3971_v12 = vor.u32 1.1754944e-38, %v1776_v1  ;;  %v1230_v37 = vsub.f32 1.0, %v1229_v57 }
 0x15c   : > { %5105 = vst [vmem:[#allocation75_spill] sm:$0xff] %v3959_v23  ;;  %v3973_v23 = vor.u32 1.1754944e-38, %v1239_v19  ;;  %v3975_v62 = vpop.f32.mrf.mxu3  ;;  %v1244_v34 = vmul.f32 %v3938_v11, %v3871_v60  ;;  %v2543_v63 = vmul.f32 -1.442695, %v1318_v28  ;;  %v1319_v22 = vsub.f32 %v3653_v58, %v3891_v31  ;;  %vm4041_vm9 = vmor %vm1740_vm1, %vm1741_vm15 }
 0x15d   : > { %5107 = vst [vmem:[#allocation77_spill] sm:$0xff] %v3975_v62  ;;  %v3983_v25 = vmul.f32 %v3896_v10, %v1752_v48  ;;  %v3985_v7 = vor.u32 1.1754944e-38, %v1254_v35  ;;  %v1259_v1 = vmul.f32 %v3951_v36, %v3879_v46  ;;  %v1269_v57 = vand.u32 2147483648, %v3879_v46  ;;  %v996_v35 = vpop.f32.mrf.mxu0  ;;  %vm4103_vm1 = vmor %vm1203_vm5, %vm1204_vm3 }
 0x15e   : > { %5106 = vst [vmem:[#allocation76_spill] sm:$0xff] %v3973_v23  ;;  %v1274_v48 = vmul.f32 %v3962_v21, %v3886_v27  ;;  %v1872_v15 = vmul.f32 %v3968_v30, %v3894_v44  ;;  %v1231_v56 = vmul.f32 %v3911_v45, %v1230_v37  ;;  %v1284_v23 = vand.u32 2147483648, %v3886_v27  ;;  %v1037_v44 = vpop.f32.mrf.mxu1 }
 0x15f   : > { %5108 = vst [vmem:[#allocation78_spill] sm:$0xff] %v3985_v7  ;;  %v2752_v62 = vpop.eup %2751  ;;  %v4005_v7 = vmul.f32 %v3903_v47, %v1767_v0  ;;  %v1559_v31 = vsel %vm3994_vm2, %v3780_v40, %v3914_v29  ;;  %v1245_v28 = vsub.f32 1.0, %v1244_v34  ;;  %2755 = vpow2.f32 %v2543_v63 }
 0x160   : > { %v2754_v46 = vpop.eup %2753  ;;  %v2544_v60 = vmul.f32 -1.442695, %v1319_v22  ;;  %v1848_v0 = vmul.f32 %v3873_v51, %v3562_v16  ;;  %v1260_v37 = vsub.f32 1.0, %v1259_v1  ;;  %v4017_v50 = vor.u32 1.1754944e-38, %v1269_v57 }
 0x161   : > { %v1500_v27 = vsub.f32 %v3630_v6, %v996_v35  ;;  %v1739_v19 = vadd.f32 %v3875_v53, %v1738_v55  ;;  %vm1572_vm6 = vweird.f32 %v3793_v2  ;;  %v1275_v40 = vsub.f32 1.0, %v1274_v48 }
 0x162   : > { %v4023_v29 = vadd.f32 1.0, %v2752_v62  ;;  %v1880_v34 = vsub.f32 2.0, %v1872_v15  ;;  %v1564_v16 = vsel %vm3953_vm14, %v3884_v42, %v1559_v31  ;;  %vm1387_vm7 = vweird.f32 %v3667_v41 }
 0x163   : > { %v4030_v51 = vadd.f32 %v3911_v45, %v1231_v56  ;;  %v4032_v63 = vadd.f32 1.0, %v2754_v46  ;;  %v1501_v55 = vsub.f32 %v3634_v59, %v1037_v44  ;;  %v1744_v22 = vand.u32 2147483647, %v3803_v8  ;;  %v1078_v1 = vpop.f32.mrf.mxu2  ;;  %vm4122_vm3 = vmor %vm1387_vm7, %vm1388_vm4 }
 0x164   : > { %vm1571_vm8 = vweird.f32 %v3752_v26  ;;  %v1246_v49 = vmul.f32 %v3938_v11, %v1245_v28  ;;  %v4046_v62 = vor.u32 1.1754944e-38, %v1284_v23  ;;  %2757 = vpow2.f32 %v2544_v60  ;;  %v1119_v28 = vpop.f32.mrf.mxu3 }
 0x165   : > { %v1856_v46 = vadd.f32 %v1848_v0, %v1672_v20  ;;  %v5114_v15 = vand.u32 2147483647, %v3570_v9  ;;  %v1261_v31 = vmul.f32 %v3951_v36, %v1260_v37  ;;  %v2549_v48 = vmul.f32 -1.442695, %v1500_v27  ;;  %v2756_v23 = vpop.eup %2755  ;;  %vm1573_vm4 = vmor %vm1571_vm8, %vm1572_vm6  ;;  %v2153_v20 = vld [vmem:[%s4997_s4 + $0x8] sm:$0xff] }
 0x166   : > { %5113 = vst [vmem:[#allocation79_spill] sm:$0xff] %v4046_v62  ;;  %v1657_v8 = vadd.f32 %v1564_v16, %v3949_v38  ;;  %v1743_v35 = vsel %vm4041_vm9, %v3875_v53, %v1739_v19  ;;  %v5117_v60 = vand.u32 2147483647, %v3667_v41  ;;  %v5120_v56 = vand.u32 2147483647, %v3752_v26  ;;  %2163 = vperm.xlu1 %2667, %v2153_v20  }
 0x167   : > { %vm4050_vm10 = vcmp.eq.f32.partialorder %v5114_v15, 8.507059e+37  ;;  %vm1756_vm13 = vweird.f32 %v3896_v10  ;;  %v1276_v38 = vmul.f32 %v3962_v21, %v1275_v40  ;;  %2759 = vrcp.f32 %v4023_v29  ;;  %v4084_v40 = vld [vmem:[%s4996_s3] sm:$0xff] }
 0x168   : > { %vm4061_vm11 = vcmp.eq.f32.partialorder %v5117_v60, 8.507059e+37  ;;  %vm4067_vm12 = vcmp.eq.f32.partialorder %v5120_v56, 8.507059e+37  ;;  %v1888_v53 = vmul.f32 %v3968_v30, %v1880_v34  ;;  %v1502_v27 = vsub.f32 %v3642_v54, %v1078_v1  ;;  %5123 = vst [vmem:[#allocation80_spill] sm:$0xff] %v4084_v40 }
 0x169   : > { %v1423_v0 = vand.u32 2147483648, %v4023_v29  ;;  %2761 = vrcp.f32 %v4032_v63  ;;  %v2550_v37 = vmul.f32 -1.442695, %v1501_v55  ;;  %vm1745_vm14 = vcmp.eq.f32.partialorder %v1744_v22, 8.507059e+37 }
 0x16a   : > { %vm1755_vm15 = vweird.f32 %v3829_v32  ;;  %v1438_v19 = vand.u32 2147483648, %v4032_v63  ;;  %v1896_v42 = vmul.f32 %v1888_v53, %v1856_v46  ;;  %v1748_v15 = vsel %vm1745_vm14, %v3943_v39, %v1743_v35  ;;  %v2758_v1 = vpop.eup %2757 }
 0x16b   : > { %v1503_v30 = vsub.f32 %v3653_v58, %v1119_v28  ;;  %v4087_v34 = vadd.f32 1.0, %v2756_v23  ;;  %2763 = vpow2.f32 %v2549_v48  ;;  %v1665_v55 = vmul.f32 %v1564_v16, %v3538_v18 }
 0x16c   : > { %v4090_v22 = vadd.f32 %v1748_v15, %v1657_v8  ;;  %v4093_v60 = vadd.f32 %v3938_v11, %v1246_v49  ;;  %v4096_v39 = vadd.f32 %v3951_v36, %v1261_v31  ;;  %1935 = vmatpush.msra.mxu0 %v1896_v42  ;;  %v2551_v35 = vmul.f32 -1.442695, %v1502_v27  ;;  %v5130_v27 = vld [vmem:[#allocation72_spill] sm:$0xff]  ;;  %v5151_v49 = vld [vmem:[#allocation63_spill] sm:$0xff] }
 0x16d   : > { %vm1219_vm2 = vweird.f32 %v3626_v13  ;;  %v4109_v18 = vadd.f32 %v3962_v21, %v1276_v38  ;;  %v4111_v16 = vor.u32 1.1754944e-38, %v1423_v0  ;;  %2765 = vpow2.f32 %v2550_v37  ;;  %2561 = vmatmul.msk.f32.vlgmr.msra.gmra.mxu0 %vm5015_vm0, %v4084_v40  ;;  %v4116_v31 = vpop.eup %2759 }
 0x16e   : > { %vm1403_vm5 = vweird.f32 %v3757_v52  ;;  %v4127_v8 = vor.u32 1.1754944e-38, %v1438_v19  ;;  %2767 = vrcp.f32 %v4090_v22  ;;  %v2552_v28 = vmul.f32 -1.442695, %v1503_v30  ;;  %v5131_v19 = vld [vmem:[#allocation58_spill] sm:$0xff]  ;;  %v5132_v30 = vld [vmem:[#allocation69_spill] sm:$0xff] }
 0x16f   : > { %5126 = vst [vmem:[#allocation81_spill] sm:$0xff] %v4109_v18  ;;  %v1206_v23 = vsel %vm4103_vm1, %v3620_v61, %v3747_v17  ;;  %v4134_v56 = vpop.eup %2761  ;;  %vm1218_vm9 = vweird.f32 %v3576_v4  ;;  %2769 = vrcp.f32 %v4087_v34  ;;  %v1453_v41 = vand.u32 2147483648, %v4087_v34  ;;  %v5129_v17 = vld [vmem:[#allocation62_spill] sm:$0xff] }
 0x170   : > { %v4143_v38 = vadd.f32 1.0, %v2758_v1  ;;  %v1673_v53 = vadd.f32 %v1665_v55, %v3799_v5  ;;  %vm1402_vm7 = vweird.f32 %v3675_v33  ;;  %vm1587_vm14 = vweird.f32 %v3831_v3  ;;  %v5133_v55 = vld [vmem:[#allocation55_spill] sm:$0xff] }
 0x171   : > { %2771 = vpow2.f32 %v2551_v35  ;;  %v1211_v61 = vsel %vm4050_vm10, %v3716_v43, %v1206_v23  ;;  %v1390_v26 = vsel %vm4122_vm3, %v3727_v14, %v5129_v17  ;;  %v1574_v0 = vsel %vm1573_vm4, %v3793_v2, %v5130_v27  ;;  %v2764_v37 = vpop.eup %2763  ;;  %v5134_v2 = vld [vmem:[#allocation42_spill] sm:$0xff]  ;;  %vm4241_vm3 = vmor %vm1218_vm9, %vm1219_vm2  ;;  %v5167_v23 = vld [vmem:[#allocation41_spill] sm:$0xff] }
 0x172   : > { %v1413_v5 = vmul.f32 %v4116_v31, %v4023_v29  ;;  %v1395_v42 = vsel %vm4061_vm11, %v5131_v19, %v1390_v26  ;;  %v1579_v43 = vsel %vm4067_vm12, %v5132_v30, %v1574_v0  ;;  %v1754_v57 = vadd.f32 %v3896_v10, %v3983_v25  ;;  %vm4186_vm11 = vmor %vm1755_vm15, %vm1756_vm13  ;;  %v5143_v26 = vld [vmem:[#allocation40_spill] sm:$0xff]  ;;  %v4222_v25 = vpop.f32.mrf.mxu1 }
 0x173   : > { %vm1586_vm6 = vweird.f32 %v5133_v55  ;;  %2773 = vpow2.f32 %v2552_v28  ;;  %v1474_v14 = vadd.f32 %v1395_v42, %v1211_v61  ;;  %v1482_v1 = vmul.f32 %v1395_v42, %v5134_v2  ;;  %v2766_v48 = vpop.eup %2765  ;;  %v5144_v0 = vld [vmem:[#allocation44_spill] sm:$0xff]  ;;  %v5145_v2 = vld [vmem:[#allocation46_spill] sm:$0xff]  ;;  %v4205_v28 = vpop.f32.mrf.mxu0  ;;  %5150 = vst [vmem:[#allocation72_spill] sm:$0xff] %v4222_v25  ;;  %vm4253_vm4 = vmor %vm1402_vm7, %vm1403_vm5 }
 0x174   : > { %v1759_v35 = vand.u32 2147483647, %v3829_v32  ;;  %v5135_v9 = vand.u32 2147483647, %v3576_v4  ;;  %v5138_v44 = vand.u32 2147483647, %v3675_v33  ;;  %v1298_v27 = vmul.f32 %v1211_v61, %v5143_v26  ;;  %v2768_v42 = vpop.eup %2767  ;;  %vm4281_vm2 = vmor %vm1586_vm6, %vm1587_vm14 }
 0x175   : > { %v1468_v17 = vand.u32 2147483648, %v4143_v38  ;;  %v1666_v19 = vmul.f32 %v1579_v43, %v5144_v0  ;;  %vm1771_vm12 = vweird.f32 %v3903_v47  ;;  %v4197_v30 = vmul.f32 %v4134_v56, %v4032_v63  ;;  %5146 = vst [vmem:[#allocation62_spill] sm:$0xff] %v4205_v28  ;;  %v4210_v61 = vld [vmem:[%s4996_s3 + $0x8] sm:$0xff]  ;;  %v4212_v26 = vpop.eup %2769  ;;  %v4230_v28 = vpop.f32.mrf.mxu2  ;;  %v5189_v25 = vld [vmem:[#allocation76_spill] sm:$0xff] }
 0x176   : > { %vm4172_vm8 = vcmp.eq.f32.partialorder %v5135_v9, 8.507059e+37  ;;  %vm4178_vm10 = vcmp.eq.f32.partialorder %v5138_v44, 8.507059e+37  ;;  %v4199_v32 = vadd.f32 1.0, %v2764_v37  ;;  %v1849_v9 = vmul.f32 %v1748_v15, %v5145_v2  ;;  %2562 = vmatmul.msk.f32.gmra.mxu0 %vm5015_vm0, %v4210_v61  ;;  %5152 = vst [vmem:[#allocation58_spill] sm:$0xff] %v4230_v28 }
 0x177   : > { %v1758_v44 = vsel %vm4186_vm11, %v3896_v10, %v1754_v57  ;;  %v5147_v0 = vand.u32 2147483647, %v5133_v55  ;;  %2775 = vrcp.f32 %v4143_v38  ;;  %v1873_v15 = vmul.f32 %v2768_v42, %v4090_v22  ;;  %v2772_v2 = vpop.eup %2771 }
 0x178   : > { %v1490_v10 = vadd.f32 %v1482_v1, %v1298_v27  ;;  %v1658_v57 = vadd.f32 %v1579_v43, %v1474_v14  ;;  %vm1770_vm15 = vweird.f32 %v5151_v49  ;;  %v1414_v46 = vsub.f32 1.0, %v1413_v5  ;;  %v4235_v1 = vpop.f32.mrf.mxu3 }
 0x179   : > { %vm4216_vm13 = vcmp.eq.f32.partialorder %v5147_v0, 8.507059e+37  ;;  %v4227_v62 = vor.u32 1.1754944e-38, %v1453_v41  ;;  %vm1760_vm1 = vcmp.eq.f32.partialorder %v1759_v35, 8.507059e+37  ;;  %v4232_v18 = vadd.f32 1.0, %v2766_v48  ;;  %5153 = vst [vmem:[#allocation69_spill] sm:$0xff] %v4235_v1  ;;  %v2774_v27 = vpop.eup %2773  ;;  %v5165_v41 = vld [vmem:[#allocation59_spill] sm:$0xff]  ;;  %vm1772_vm5 = vmor %vm1770_vm15, %vm1771_vm12 }
 0x17a   : > { %v1881_v22 = vsub.f32 2.0, %v1873_v15  ;;  %v1674_v43 = vadd.f32 %v1666_v19, %v1490_v10  ;;  %v1763_v14 = vsel %vm1760_vm1, %v3965_v24, %v1758_v44  ;;  %v1429_v5 = vsub.f32 1.0, %v4197_v30  ;;  %v5159_v15 = vld [vmem:[#allocation47_spill] sm:$0xff]  ;;  %v5160_v30 = vld [vmem:[#allocation54_spill] sm:$0xff] }
 0x17b   : > { %v4246_v35 = vor.u32 1.1754944e-38, %v1468_v17  ;;  %2777 = vrcp.f32 %v4199_v32  ;;  %v1857_v48 = vadd.f32 %v1849_v9, %v1673_v53  ;;  %v4257_v19 = vadd.f32 1.0, %v2772_v2  ;;  %v5161_v9 = vld [vmem:[#allocation65_spill] sm:$0xff]  ;;  %v5166_v24 = vld [vmem:[#allocation74_spill] sm:$0xff] }
 0x17c   : > { %v1889_v4 = vmul.f32 %v2768_v42, %v1881_v22  ;;  %v1842_v44 = vadd.f32 %v1763_v14, %v1658_v57  ;;  %v1850_v10 = vmul.f32 %v1763_v14, %v5159_v15  ;;  %v4261_v17 = vmul.f32 %v4116_v31, %v1414_v46  ;;  %v5164_v14 = vld [vmem:[#allocation53_spill] sm:$0xff] }
 0x17d   : > { %5156 = vst [vmem:[#allocation55_spill] sm:$0xff] %v4246_v35  ;;  %v4265_v53 = vmul.f32 %v4212_v26, %v4087_v34  ;;  %v1221_v33 = vsel %vm4241_vm3, %v3626_v13, %v5160_v30  ;;  %v1405_v42 = vsel %vm4253_vm4, %v3757_v52, %v5161_v9  ;;  %v4275_v57 = vpop.eup %2775  ;;  %2779 = vrcp.f32 %v4232_v18  ;;  %v1002_v30 = vpop.f32.mrf.mxu0  ;;  %v5193_v35 = vld [vmem:[#allocation67_spill] sm:$0xff] }
 0x17e   : > { %v1897_v2 = vmul.f32 %v1889_v4, %v1857_v48  ;;  %v4286_v22 = vadd.f32 1.0, %v2774_v27  ;;  %v4288_v13 = vadd.f32 %v1850_v10, %v1674_v43  ;;  %2781 = vrcp.f32 %v1842_v44  ;;  %v4303_v43 = vld [vmem:[%s4996_s3 + $0x10] sm:$0xff]  ;;  %v5168_v4 = vld [vmem:[#allocation43_spill] sm:$0xff] }
 0x17f   : > { %v1226_v52 = vsel %vm4172_vm8, %v5164_v14, %v1221_v33  ;;  %v1410_v55 = vsel %vm4178_vm10, %v5165_v41, %v1405_v42  ;;  %v1589_v15 = vsel %vm4281_vm2, %v3831_v3, %v5166_v24  ;;  %2783 = vrcp.f32 %v4257_v19  ;;  %2563 = vmatmul.msk.f32.gmra.mxu0 %vm5015_vm0, %v4303_v43  ;;  %v5169_v33 = vld [vmem:[#allocation70_spill] sm:$0xff]  ;;  %v1043_v41 = vpop.f32.mrf.mxu1 }
 0x180   : > { %1964 = vmatpush.msra.mxu1 %v1897_v2  ;;  %v1299_v27 = vmul.f32 %v1226_v52, %v5167_v23  ;;  %v1475_v48 = vadd.f32 %v1410_v55, %v1226_v52  ;;  %v1483_v10 = vmul.f32 %v1410_v55, %v5168_v4  ;;  %v1594_v9 = vsel %vm4216_vm13, %v5169_v33, %v1589_v15  ;;  %v5170_v55 = vld [vmem:[#allocation45_spill] sm:$0xff]  ;;  %v1084_v15 = vpop.f32.mrf.mxu2  ;;  %v1125_v4 = vpop.f32.mrf.mxu3  ;;  %v5171_v33 = vld [vmem:[#allocation48_spill] sm:$0xff] }
 0x181   : > { %v4313_v3 = vpop.eup %2777  ;;  %2565 = vmatmul.msk.f32.vlgmr.msra.gmra.mxu1 %vm5015_vm0, %v4084_v40  ;;  %v1769_v42 = vadd.f32 %v3903_v47, %v4005_v7  ;;  %v1774_v46 = vand.u32 2147483647, %v5151_v49  ;;  %v1684_v2 = vsub.f32 %v3630_v6, %v1002_v30  ;;  %v1430_v14 = vmul.f32 %v4134_v56, %v1429_v5 }
 0x182   : > { %v1458_v52 = vmul.f32 %v4275_v57, %v4143_v38  ;;  %2785 = vrcp.f32 %v4286_v22  ;;  %v1491_v37 = vadd.f32 %v1483_v10, %v1299_v27  ;;  %v1659_v7 = vadd.f32 %v1594_v9, %v1475_v48 }
 0x183   : > { %v1667_v24 = vmul.f32 %v1594_v9, %v5170_v55  ;;  %v1773_v6 = vsel %vm1772_vm5, %v3903_v47, %v1769_v42  ;;  %vm1775_vm9 = vcmp.eq.f32.partialorder %v1774_v46, 8.507059e+37  ;;  %v4334_v30 = vpop.eup %2779  ;;  %v1444_v49 = vsub.f32 1.0, %v4265_v53 }
 0x184   : > { %v1597_v5 = vmul.f32 %v4313_v3, %v4199_v32  ;;  %v1778_v20 = vsel %vm1775_vm9, %v3971_v12, %v1773_v6  ;;  %v2557_v23 = vmul.f32 -1.442695, %v1684_v2  ;;  %v2782_v27 = vpop.eup %2781  ;;  %v1685_v47 = vsub.f32 %v3634_v59, %v1043_v41  ;;  %v2154_v59 = vld [vmem:[%s4997_s4 + $0x10] sm:$0xff] }
 0x185   : > { %v1675_v10 = vadd.f32 %v1667_v24, %v1491_v37  ;;  %v1843_v48 = vadd.f32 %v1778_v20, %v1659_v7  ;;  %v1851_v9 = vmul.f32 %v1778_v20, %v5171_v33  ;;  %v4342_v42 = vpop.eup %2783  ;;  %vm1234_vm7 = vweird.f32 %v3911_v45  ;;  %v4352_v37 = vld [vmem:[%s4996_s3 + $0x18] sm:$0xff]  ;;  %2168 = vperm.xlu1 %2667, %v2154_v59  }
 0x186   : > { %v1459_v46 = vsub.f32 1.0, %v1458_v52  ;;  %v1874_v53 = vmul.f32 %v2782_v27, %v1842_v44  ;;  %2787 = vpow2.f32 %v2557_v23  ;;  %v1686_v55 = vsub.f32 %v3642_v54, %v1084_v15  ;;  %v5172_v44 = vld [vmem:[#allocation64_spill] sm:$0xff] }
 0x187   : > { %v4346_v0 = vadd.f32 %v1851_v9, %v1675_v10  ;;  %2789 = vrcp.f32 %v1843_v48  ;;  %v2558_v12 = vmul.f32 -1.442695, %v1685_v47  ;;  %v1687_v2 = vsub.f32 %v3653_v58, %v1125_v4  ;;  %2564 = vmatmul.msk.f32.gmra.mxu0 %vm5015_vm0, %v4352_v37 }
 0x188   : > { %v4357_v52 = vpop.eup %2785  ;;  %vm1233_vm14 = vweird.f32 %v5172_v44  ;;  %v1598_v54 = vsub.f32 1.0, %v1597_v5  ;;  %v1607_v41 = vand.u32 2147483648, %v4199_v32  ;;  %v1882_v7 = vsub.f32 2.0, %v1874_v53 }
 0x189   : > { %v2559_v24 = vmul.f32 -1.442695, %v1686_v55  ;;  %vm1418_vm6 = vweird.f32 %v4116_v31  ;;  %v1445_v58 = vmul.f32 %v4212_v26, %v1444_v49  ;;  %v1612_v6 = vmul.f32 %v4334_v30, %v4232_v18  ;;  %2566 = vmatmul.msk.f32.gmra.mxu1 %vm5015_vm0, %v4210_v61  ;;  %vm4431_vm3 = vmor %vm1233_vm14, %vm1234_vm7 }
 0x18a   : > { %2791 = vpow2.f32 %v2558_v12  ;;  %v2560_v15 = vmul.f32 -1.442695, %v1687_v2  ;;  %v1460_v5 = vmul.f32 %v4275_v57, %v1459_v46  ;;  %v1627_v20 = vmul.f32 %v4342_v42, %v4257_v19 }
 0x18b   : > { %v1890_v23 = vmul.f32 %v2782_v27, %v1882_v7  ;;  %2793 = vpow2.f32 %v2559_v24  ;;  %vm1417_vm8 = vweird.f32 %v4023_v29  ;;  %v1605_v49 = vand.u32 2147483647, %v4199_v32 }
 0x18c   : > { %v1622_v4 = vand.u32 2147483648, %v4232_v18  ;;  %v1642_v10 = vmul.f32 %v4357_v52, %v4286_v22  ;;  %2795 = vpow2.f32 %v2560_v15  ;;  %v2788_v33 = vpop.eup %2787  ;;  %v5173_v9 = vand.u32 2147483647, %v5172_v44  ;;  %vm4465_vm5 = vmor %vm1417_vm8, %vm1418_vm6 }
 0x18d   : > { %v4385_v27 = vadd.f32 %v4116_v31, %v4261_v17  ;;  %v4388_v46 = vadd.f32 %v4134_v56, %v1430_v14  ;;  %v1599_v53 = vmul.f32 %v4313_v3, %v1598_v54  ;;  %v1898_v55 = vmul.f32 %v1890_v23, %v4288_v13  ;;  %v2790_v12 = vpop.eup %2789 }
 0x18e   : > { %vm4379_vm10 = vcmp.eq.f32.partialorder %v5173_v9, 8.507059e+37  ;;  %v4393_v2 = vadd.f32 %v4212_v26, %v1445_v58  ;;  %vm1601_vm11 = vweird.f32 %v4199_v32  ;;  %v4396_v59 = vor.u32 1.1754944e-38, %v1607_v41 }
 0x18f   : > { %v1613_v7 = vsub.f32 1.0, %v1612_v6  ;;  %v4398_v24 = vadd.f32 1.0, %v2788_v33  ;;  %v4401_v17 = vadd.f32 %v4275_v57, %v1460_v5  ;;  %vm1602_vm12 = vweird.f32 %v4313_v3  ;;  %1993 = vmatpush.msra.mxu2 %v1898_v55  ;;  %v5263_v55 = vld [vmem:[#allocation73_spill] sm:$0xff] }
 0x190   : > { %v1628_v14 = vsub.f32 1.0, %v1627_v20  ;;  %v1875_v54 = vmul.f32 %v2790_v12, %v1843_v48  ;;  %v2792_v13 = vpop.eup %2791  ;;  %v5176_v15 = vand.u32 2147483647, %v4023_v29  ;;  %vm1433_vm15 = vweird.f32 %v4134_v56  ;;  %2569 = vmatmul.msk.f32.vlgmr.msra.gmra.mxu2 %vm5015_vm0, %v4084_v40  ;;  %v2155_v48 = vld [vmem:[%s4997_s4 + $0x18] sm:$0xff]  ;;  %vm4505_vm14 = vmor %vm1601_vm11, %vm1602_vm12 }
 0x191   : > { %v1620_v41 = vand.u32 2147483647, %v4232_v18  ;;  %v4412_v6 = vor.u32 1.1754944e-38, %v1622_v4  ;;  %v1643_v5 = vsub.f32 1.0, %v1642_v10  ;;  %2797 = vrcp.f32 %v4398_v24  ;;  %v2794_v20 = vpop.eup %2793  ;;  %2173 = vperm.xlu2 %2668, %v2155_v48   ;;  %2567 = vmatmul.msk.f32.gmra.mxu1 %vm5015_vm0, %v4303_v43 }
 0x192   : > { %vm4406_vm13 = vcmp.eq.f32.partialorder %v5176_v15, 8.507059e+37  ;;  %vm1249_vm1 = vweird.f32 %v3938_v11  ;;  %v4422_v23 = vadd.f32 %v4313_v3, %v1599_v53  ;;  %v1637_v33 = vand.u32 2147483648, %v4257_v19  ;;  %v2796_v10 = vpop.eup %2795  ;;  %v5183_v15 = vld [vmem:[#allocation66_spill] sm:$0xff] }
 0x193   : > { %v1883_v4 = vsub.f32 2.0, %v1875_v54  ;;  %v4425_v9 = vadd.f32 1.0, %v2792_v13  ;;  %vm1432_vm4 = vweird.f32 %v4032_v63  ;;  %vm4436_vm2 = vcmp.eq.f32.partialorder %v1605_v49, 8.507059e+37 }
 0x194   : > { %v1614_v54 = vmul.f32 %v4334_v30, %v1613_v7  ;;  %v1652_v13 = vand.u32 2147483648, %v4286_v22  ;;  %v4445_v44 = vadd.f32 1.0, %v2794_v20  ;;  %vm1248_vm9 = vweird.f32 %v5183_v15  ;;  %vm4570_vm6 = vmor %vm1432_vm4, %vm1433_vm15 }
 0x195   : > { %v1629_v48 = vmul.f32 %v4342_v42, %v1628_v14  ;;  %v1891_v1 = vmul.f32 %v2790_v12, %v1883_v4  ;;  %2799 = vrcp.f32 %v4425_v9  ;;  %v1236_v49 = vsel %vm4431_vm3, %v3911_v45, %v4030_v51  ;;  %v5200_v12 = vld [vmem:[#allocation49_spill] sm:$0xff]  ;;  %vm4588_vm15 = vmor %vm1248_vm9, %vm1249_vm1 }
 0x196   : > { %vm1616_vm7 = vweird.f32 %v4232_v18  ;;  %v1644_v7 = vmul.f32 %v4357_v52, %v1643_v5  ;;  %v1791_v28 = vand.u32 2147483648, %v4398_v24  ;;  %2801 = vrcp.f32 %v4445_v44 }
 0x197   : > { %v4458_v20 = vadd.f32 1.0, %v2796_v10  ;;  %v1635_v45 = vand.u32 2147483647, %v4257_v19  ;;  %v4470_v51 = vor.u32 1.1754944e-38, %v1637_v33  ;;  %v1899_v5 = vmul.f32 %v1891_v1, %v4346_v0  ;;  %v4474_v4 = vpop.eup %2797 }
 0x198   : > { %v5186_v10 = vand.u32 2147483647, %v4032_v63  ;;  %v4484_v29 = vadd.f32 %v4334_v30, %v1614_v54  ;;  %v1806_v33 = vand.u32 2147483648, %v4425_v9  ;;  %v1241_v14 = vsel %vm4379_vm10, %v5189_v25, %v1236_v49  ;;  %2570 = vmatmul.msk.f32.gmra.mxu2 %vm5015_vm0, %v4210_v61 }
 0x199   : > { %v1420_v0 = vsel %vm4465_vm5, %v4116_v31, %v4385_v27  ;;  %v5190_v1 = vand.u32 2147483647, %v5183_v15  ;;  %v4510_v25 = vadd.f32 %v4342_v42, %v1629_v48  ;;  %v4512_v31 = vor.u32 1.1754944e-38, %v1652_v13  ;;  %2022 = vmatpush.msra.mxu3 %v1899_v5  ;;  %2568 = vmatmul.msk.f32.gmra.mxu1 %vm5015_vm0, %v4352_v37 }
 0x19a   : > { %vm4478_vm3 = vcmp.eq.f32.partialorder %v5186_v10, 8.507059e+37  ;;  %v1781_v27 = vmul.f32 %v4474_v4, %v4398_v24  ;;  %2803 = vrcp.f32 %v4458_v20  ;;  %vm4518_vm5 = vcmp.eq.f32.partialorder %v1620_v41, 8.507059e+37  ;;  %2573 = vmatmul.msk.f32.vlgmr.msra.gmra.mxu3 %vm5015_vm0, %v4084_v40 }
 0x19b   : > { %vm4496_vm8 = vcmp.eq.f32.partialorder %v5190_v1, 8.507059e+37  ;;  %5196 = vst [vmem:[#allocation42_spill] sm:$0xff] %v4512_v31  ;;  %v4523_v32 = vadd.f32 %v4357_v52, %v1644_v7  ;;  %vm1785_vm11 = vweird.f32 %v4398_v24  ;;  %v1792_v13 = vor.u32 1.1754944e-38, %v1791_v28  ;;  %v4534_v48 = vpop.eup %2799  ;;  %v5211_v31 = vld [vmem:[#allocation56_spill] sm:$0xff] }
 0x19c   : > { %v1604_v41 = vsel %vm4505_vm14, %v4313_v3, %v4422_v23  ;;  %v1782_v49 = vsub.f32 1.0, %v1781_v27  ;;  %v1821_v7 = vand.u32 2147483648, %v4445_v44  ;;  %v4539_v5 = vmul.f32 %v1241_v14, %v5200_v12  ;;  %v4544_v28 = vpop.eup %2801 }
 0x19d   : > { %5199 = vst [vmem:[#allocation40_spill] sm:$0xff] %v4523_v32  ;;  %v1425_v1 = vsel %vm4406_vm13, %v4111_v16, %v1420_v0  ;;  %v5201_v40 = vand.u32 2147483647, %v4087_v34  ;;  %vm1786_vm14 = vweird.f32 %v4474_v4  ;;  %v1796_v23 = vmul.f32 %v4534_v48, %v4425_v9 }
 0x19e   : > { %v4556_v47 = vor.u32 1.1754944e-38, %v1806_v33  ;;  %v5204_v16 = vand.u32 2147483647, %v5193_v35  ;;  %v1783_v33 = vmul.f32 %v4474_v4, %v1782_v49  ;;  %v1811_v0 = vmul.f32 %v4544_v28, %v4445_v44 }
 0x19f   : > { %vm4548_vm10 = vcmp.eq.f32.partialorder %v5201_v40, 8.507059e+37  ;;  %v4581_v27 = vsel %vm4436_vm2, %v4396_v59, %v1604_v41  ;;  %v1789_v12 = vand.u32 2147483647, %v4398_v24  ;;  %v1797_v49 = vsub.f32 1.0, %v1796_v23  ;;  %v5217_v41 = vld [vmem:[#allocation68_spill] sm:$0xff] }
 0x1a0   : > { %vm4562_vm13 = vcmp.eq.f32.partialorder %v5204_v16, 8.507059e+37  ;;  %v1476_v16 = vadd.f32 %v1425_v1, %v1241_v14  ;;  %v1484_v32 = vmul.f32 %v1425_v1, %v5211_v31  ;;  %v1435_v59 = vsel %vm4570_vm6, %v4134_v56, %v4388_v46  ;;  %v4598_v53 = vpop.eup %2803  ;;  %2571 = vmatmul.msk.f32.gmra.mxu2 %vm5015_vm0, %v4303_v43 }
 0x1a1   : > { %vm5212_vm1 = vweird.f32 %v4334_v30  ;;  %vm4609_vm4 = vcmp.eq.f32.partialorder %v1635_v45, 8.507059e+37  ;;  %v1812_v31 = vsub.f32 1.0, %v1811_v0  ;;  %vm1815_vm12 = vweird.f32 %v4445_v44 }
 0x1a2   : > { %vm4605_vm9 = vmor %vm1616_vm7, %vm5212_vm1  ;;  %v4614_v56 = vor.u32 1.1754944e-38, %v1821_v7  ;;  %v1784_v46 = vadd.f32 %v4474_v4, %v1783_v33  ;;  %v1251_v18 = vsel %vm4588_vm15, %v3938_v11, %v4093_v60  ;;  %vm1278_vm7 = vweird.f32 %v5217_v41  ;;  %2574 = vmatmul.msk.f32.gmra.mxu3 %vm5015_vm0, %v4210_v61 }
 0x1a3   : > { %vm4627_vm1 = vmor %vm1785_vm11, %vm1786_vm14  ;;  %v1798_v7 = vmul.f32 %v4534_v48, %v1797_v49  ;;  %v1836_v1 = vand.u32 2147483648, %v4458_v20  ;;  %v1660_v23 = vadd.f32 %v4581_v27, %v1476_v16  ;;  %v1619_v11 = vsel %vm4605_vm9, %v4334_v30, %v4484_v29  ;;  %v5267_v16 = vld [vmem:[#allocation60_spill] sm:$0xff] }
 0x1a4   : > { %v1788_v60 = vsel %vm4627_vm1, %v4474_v4, %v1784_v46  ;;  %vm1790_vm11 = vcmp.eq.f32.partialorder %v1789_v12, 8.507059e+37  ;;  %v1440_v24 = vsel %vm4478_vm3, %v4127_v8, %v1435_v59  ;;  %v1804_v40 = vand.u32 2147483647, %v4425_v9  ;;  %v5224_v4 = vld [vmem:[#allocation78_spill] sm:$0xff] }
 0x1a5   : > { %vm5220_vm14 = vweird.f32 %v3951_v36  ;;  %vm5221_vm6 = vweird.f32 %v5193_v35  ;;  %vm1801_vm1 = vweird.f32 %v4534_v48  ;;  %v1826_v8 = vmul.f32 %v4598_v53, %v4458_v20 }
 0x1a6   : > { %vm4650_vm2 = vmor %vm5221_vm6, %vm5220_vm14  ;;  %v1793_v30 = vsel %vm1790_vm11, %v1792_v13, %v1788_v60  ;;  %v1256_v35 = vsel %vm4496_vm8, %v5224_v4, %v1251_v18  ;;  %vm5225_vm3 = vweird.f32 %v4212_v26  ;;  %vm5226_vm6 = vweird.f32 %v4087_v34 }
 0x1a7   : > { %vm4669_vm14 = vmor %vm5226_vm6, %vm5225_vm3  ;;  %v1813_v29 = vmul.f32 %v4544_v28, %v1812_v31  ;;  %vm1816_vm9 = vweird.f32 %v4544_v28  ;;  %v1844_v0 = vadd.f32 %v1793_v30, %v1660_v23  ;;  %v1624_v13 = vsel %vm4518_vm5, %v4412_v6, %v1619_v11  ;;  %v5259_v11 = vld [vmem:[#allocation81_spill] sm:$0xff] }
 0x1a8   : > { %v5229_v10 = vand.u32 2147483647, %v4143_v38  ;;  %v1477_v34 = vadd.f32 %v1440_v24, %v1256_v35  ;;  %v1799_v63 = vadd.f32 %v4534_v48, %v1798_v7  ;;  %v1266_v49 = vsel %vm4650_vm2, %v3951_v36, %v4096_v39  ;;  %v5258_v7 = vld [vmem:[#allocation57_spill] sm:$0xff] }
 0x1a9   : > { %v1450_v54 = vsel %vm4669_vm14, %v4212_v26, %v4393_v2  ;;  %v5232_v6 = vand.u32 2147483647, %v5217_v41  ;;  %v5235_v59 = vand.u32 2147483647, %v4286_v22  ;;  %vm5238_vm2 = vweird.f32 %v4425_v9 }
 0x1aa   : > { %vm4680_vm8 = vcmp.eq.f32.partialorder %v5229_v10, 8.507059e+37  ;;  %vm1802_vm3 = vmor %vm5238_vm2, %vm1801_vm1  ;;  %2805 = vrcp.f32 %v1844_v0  ;;  %vm1805_vm6 = vcmp.eq.f32.partialorder %v1804_v40, 8.507059e+37  ;;  %v1455_v36 = vsel %vm4548_vm10, %v4227_v62, %v1450_v54 }
 0x1ab   : > { %vm4695_vm5 = vcmp.eq.f32.partialorder %v5232_v6, 8.507059e+37  ;;  %vm4701_vm11 = vcmp.eq.f32.partialorder %v5235_v59, 8.507059e+37  ;;  %v1819_v39 = vand.u32 2147483647, %v4445_v44  ;;  %vm5239_vm14 = vweird.f32 %v4342_v42  ;;  %v5246_v44 = vld [vmem:[#allocation71_spill] sm:$0xff]  ;;  %v5266_v6 = vld [vmem:[#allocation72_spill] sm:$0xff] }
 0x1ac   : > { %vm5240_vm0 = vweird.f32 %v4257_v19  ;;  %v1827_v26 = vsub.f32 1.0, %v1826_v8  ;;  %v1661_v2 = vadd.f32 %v1624_v13, %v1477_v34  ;;  %v1803_v31 = vsel %vm1802_vm3, %v4534_v48, %v1799_v63  ;;  %v5261_v8 = vld [vmem:[#allocation40_spill] sm:$0xff] }
 0x1ad   : > { %vm1633_vm15 = vmor %vm5240_vm0, %vm5239_vm14  ;;  %v1271_v9 = vsel %vm4562_vm13, %v4017_v50, %v1266_v49  ;;  %v1808_v46 = vsel %vm1805_vm6, %v4556_v47, %v1803_v31  ;;  %v1814_v3 = vadd.f32 %v4544_v28, %v1813_v29  ;;  %vm1830_vm10 = vweird.f32 %v4458_v20 }
 0x1ae   : > { %v1478_v18 = vadd.f32 %v1455_v36, %v1271_v9  ;;  %v1634_v62 = vsel %vm1633_vm15, %v4342_v42, %v4510_v25  ;;  %vm4729_vm0 = vmor %vm1815_vm12, %vm1816_vm9  ;;  %v1492_v50 = vadd.f32 %v1484_v32, %v4539_v5  ;;  %v1845_v48 = vadd.f32 %v1808_v46, %v1661_v2 }
 0x1af   : > { %v1639_v47 = vsel %vm4609_vm4, %v4470_v51, %v1634_v62  ;;  %vm5243_vm13 = vweird.f32 %v3962_v21  ;;  %v1668_v25 = vmul.f32 %v4581_v27, %v5246_v44  ;;  %v1818_v32 = vsel %vm4729_vm0, %v4544_v28, %v1814_v3  ;;  %v5253_v27 = vld [vmem:[#allocation50_spill] sm:$0xff]  ;;  %v5270_v3 = vld [vmem:[#allocation75_spill] sm:$0xff]  ;;  %v5272_v51 = vld [vmem:[#allocation80_spill] sm:$0xff] }
 0x1b0   : > { %vm4742_vm15 = vmor %vm1278_vm7, %vm5243_vm13  ;;  %v1662_v58 = vadd.f32 %v1639_v47, %v1478_v18  ;;  %vm1820_vm12 = vcmp.eq.f32.partialorder %v1819_v39, 8.507059e+37  ;;  %vm5247_vm9 = vweird.f32 %v4275_v57  ;;  %vm5248_vm4 = vweird.f32 %v4143_v38  ;;  %v2806_v41 = vpop.eup %2805  ;;  %v5269_v18 = vld [vmem:[#allocation51_spill] sm:$0xff] }
 0x1b1   : > { %vm4755_vm1 = vmor %vm5248_vm4, %vm5247_vm9  ;;  %v1837_v5 = vor.u32 1.1754944e-38, %v1836_v1  ;;  %vm5251_vm7 = vcmask 64512   ;;  %v1301_v14 = vmul.f32 %v1256_v35, %v5253_v27  ;;  %2807 = vrcp.f32 %v1845_v48  ;;  %v5262_v35 = vld [vmem:[#allocation55_spill] sm:$0xff] }
 0x1b2   : > { %2575 = vmatmul.msk.f32.gmra.mxu3 %vm5251_vm7, %v4303_v43  ;;  %vm5252_vm2 = vmmov %vm5251_vm7  ;;  %v1823_v28 = vsel %vm1820_vm12, %v4614_v56, %v1818_v32  ;;  %vm5254_vm3 = vweird.f32 %v4357_v52  ;;  %vm5255_vm6 = vweird.f32 %v4286_v22  ;;  %v1828_v45 = vmul.f32 %v4598_v53, %v1827_v26  ;;  %v5260_v56 = vld [vmem:[#allocation62_spill] sm:$0xff] }
 0x1b3   : > { %2572 = vmatmul.msk.f32.gmra.mxu2 %vm5252_vm2, %v4352_v37  ;;  %vm4769_vm14 = vmor %vm5255_vm6, %vm5254_vm3  ;;  %v1485_v1 = vmul.f32 %v1440_v24, %v5258_v7  ;;  %v1846_v23 = vadd.f32 %v1823_v28, %v1662_v58  ;;  %v1281_v60 = vsel %vm4742_vm15, %v3962_v21, %v5259_v11  ;;  %v1852_v40 = vmul.f32 %v1793_v30, %v5260_v56  ;;  %v5278_v56 = vld [vmem:[#allocation69_spill] sm:$0xff] }
 0x1b4   : > { %v1876_v33 = vmul.f32 %v2806_v41, %v1844_v0  ;;  %v1465_v22 = vsel %vm4755_vm1, %v4275_v57, %v4401_v17  ;;  %v1649_v4 = vsel %vm4769_vm14, %v4357_v52, %v5261_v8  ;;  %vm1831_vm0 = vweird.f32 %v4598_v53  ;;  %v5264_v0 = vld [vmem:[#allocation79_spill] sm:$0xff]  ;;  %v5265_v17 = vld [vmem:[#allocation42_spill] sm:$0xff]  ;;  %vm5275_vm13 = vmmov %vm5252_vm2 }
 0x1b5   : > { %v1676_v24 = vadd.f32 %v1668_v25, %v1492_v50  ;;  %2809 = vrcp.f32 %v1846_v23  ;;  %v1470_v21 = vsel %vm4680_vm8, %v5262_v35, %v1465_v22  ;;  %v1669_v29 = vmul.f32 %v1624_v13, %v5263_v55  ;;  %vm1832_vm8 = vmor %vm1830_vm10, %vm1831_vm0  ;;  %v4849_v55 = vpop.permute.xlu0 %2158 }
 0x1b6   : > { %v1884_v30 = vsub.f32 2.0, %v1876_v33  ;;  %v1286_v57 = vsel %vm4695_vm5, %v5264_v0, %v1281_v60  ;;  %v1654_v10 = vsel %vm4701_vm11, %v5265_v17, %v1649_v4  ;;  %v1493_v52 = vadd.f32 %v1485_v1, %v1301_v14  ;;  %vm5268_vm11 = vmmov %vm5252_vm2  ;;  %v5277_v1 = vld [vmem:[#allocation77_spill] sm:$0xff]  ;;  %v5294_v17 = vld [vmem:[#allocation12_spill] sm:$0xff] }
 0x1b7   : > { %v1479_v34 = vadd.f32 %v1470_v21, %v1286_v57  ;;  %v1829_v63 = vadd.f32 %v4598_v53, %v1828_v45  ;;  %v1834_v49 = vand.u32 2147483647, %v4458_v20  ;;  %v2808_v54 = vpop.eup %2807  ;;  %v1860_v12 = vadd.f32 %v1852_v40, %v1676_v24  ;;  %vm5273_vm10 = vmmov %vm5252_vm2 }
 0x1b8   : > { %v1892_v13 = vmul.f32 %v2806_v41, %v1884_v30  ;;  %v1853_v59 = vmul.f32 %v1808_v46, %v5266_v6  ;;  %v1486_v39 = vmul.f32 %v1455_v36, %v5267_v16  ;;  %v1877_v26 = vmul.f32 %v2808_v54, %v1845_v48  ;;  %v5271_v48 = vld [vmem:[#allocation58_spill] sm:$0xff]  ;;  %v5274_v41 = vld [vmem:[#allocation61_spill] sm:$0xff]  ;;  %vm5279_vm15 = vmmov %vm5252_vm2 }
 0x1b9   : > { %v1663_v2 = vadd.f32 %v1654_v10, %v1479_v34  ;;  %v1833_v15 = vsel %vm1832_vm8, %v4598_v53, %v1829_v63  ;;  %vm1835_vm5 = vcmp.eq.f32.partialorder %v1834_v49, 8.507059e+37  ;;  %v1302_v62 = vmul.f32 %v1271_v9, %v5269_v18  ;;  %vm5280_vm12 = vmmov %vm5252_vm2  ;;  %v5295_v63 = vld [vmem:[#allocation9_spill] sm:$0xff]  ;;  %v5296_v6 = vld [vmem:[#allocation16_spill] sm:$0xff] }
 0x1ba   : > { %2576 = vmatmul.msk.f32.gmra.mxu3 %vm5268_vm11, %v4352_v37  ;;  %v1900_v31 = vmul.f32 %v1892_v13, %v1860_v12  ;;  %v1670_v20 = vmul.f32 %v1639_v47, %v5270_v3  ;;  %v1838_v19 = vsel %vm1835_vm5, %v1837_v5, %v1833_v15  ;;  %v1677_v42 = vadd.f32 %v1669_v29, %v1493_v52  ;;  %vm5281_vm9 = vmmov %vm5252_vm2  ;;  %v5297_v15 = vld [vmem:[#allocation13_spill] sm:$0xff] }
 0x1bb   : > { %v2810_v50 = vpop.eup %2809  ;;  %v1885_v44 = vsub.f32 2.0, %v1877_v26  ;;  %v1847_v46 = vadd.f32 %v1838_v19, %v1663_v2  ;;  %v1494_v36 = vadd.f32 %v1486_v39, %v1302_v62  ;;  %v1854_v25 = vmul.f32 %v1823_v28, %v5271_v48  ;;  %v5276_v28 = vld [vmem:[#allocation52_spill] sm:$0xff]  ;;  %vm5282_vm4 = vmmov %vm5252_vm2 }
 0x1bc   : > { %2051 = vmatpush.msrb.mxu0 %v1900_v31  ;;  %v1878_v58 = vmul.f32 %v2810_v50, %v1846_v23  ;;  %v1861_v53 = vadd.f32 %v1853_v59, %v1677_v42  ;;  %v1487_v38 = vmul.f32 %v1470_v21, %v5274_v41  ;;  %v1303_v7 = vmul.f32 %v1286_v57, %v5276_v28  ;;  %vm5283_vm1 = vmmov %vm5252_vm2  ;;  %v5302_v28 = vld [vmem:[#allocation11_spill] sm:$0xff] }
 0x1bd   : > { %v1893_v32 = vmul.f32 %v2808_v54, %v1885_v44  ;;  %2577 = vmatmul.msk.f32.vlgmr.msrb.gmra.mxu0 %vm5273_vm10, %v5272_v51  ;;  %2811 = vrcp.f32 %v1847_v46  ;;  %v1678_v27 = vadd.f32 %v1670_v20, %v1494_v36  ;;  %v1671_v23 = vmul.f32 %v1654_v10, %v5277_v1  ;;  %vm5284_vm7 = vmmov %vm5283_vm1  ;;  %v5298_v20 = vld [vmem:[#allocation20_spill] sm:$0xff]  ;;  %v5299_v36 = vld [vmem:[#allocation17_spill] sm:$0xff] }
 0x1be   : > { %v1886_v9 = vsub.f32 2.0, %v1878_v58  ;;  %v1495_v60 = vadd.f32 %v1487_v38, %v1303_v7  ;;  %v1855_v40 = vmul.f32 %v1838_v19, %v5278_v56  ;;  %vm5285_vm2 = vmmov %vm5283_vm1  ;;  %v5303_v1 = vld [vmem:[#allocation14_spill] sm:$0xff] }
 0x1bf   : > { %v1901_v14 = vmul.f32 %v1893_v32, %v1861_v53  ;;  %v1862_v47 = vadd.f32 %v1854_v25, %v1678_v27  ;;  %vm5286_vm3 = vmmov %vm5283_vm1  ;;  %v5300_v53 = vld [vmem:[#allocation10_spill] sm:$0xff] }
 0x1c0   : > { %v1894_v5 = vmul.f32 %v2810_v50, %v1886_v9  ;;  %v1679_v22 = vadd.f32 %v1671_v23, %v1495_v60  ;;  %vm5287_vm6 = vmmov %vm5283_vm1 }
 0x1c1   : > { %2080 = vmatpush.msrb.mxu1 %v1901_v14  ;;  %vm5288_vm14 = vmmov %vm5283_vm1 }
 0x1c2   : > { %2581 = vmatmul.msk.f32.vlgmr.msrb.gmra.mxu1 %vm5275_vm13, %v5272_v51  ;;  %v1902_v45 = vmul.f32 %v1894_v5, %v1862_v47  ;;  %v1863_v4 = vadd.f32 %v1855_v40, %v1679_v22  ;;  %vm5289_vm0 = vmmov %vm5283_vm1  ;;  %v5301_v47 = vld [vmem:[#allocation21_spill] sm:$0xff] }
 0x1c3   : > { %v2812_v11 = vpop.eup %2811  ;;  %vm5290_vm8 = vmmov %vm5289_vm0 }
 0x1c4   : > { %2109 = vmatpush.msrb.mxu2 %v1902_v45  ;;  %v1879_v33 = vmul.f32 %v2812_v11, %v1847_v46  ;;  %vm5291_vm5 = vmmov %vm5289_vm0 }
 0x1c5   : > { %2585 = vmatmul.msk.f32.vlgmr.msrb.gmra.mxu2 %vm5279_vm15, %v5272_v51  ;;  %2578 = vmatmul.msk.f32.gmra.mxu0 %vm5280_vm12, %v4210_v61  ;;  %vm5292_vm11 = vmmov %vm5289_vm0 }
 0x1c6   : > { %v1887_v8 = vsub.f32 2.0, %v1879_v33 }
 0x1c8   : > { %v1895_v24 = vmul.f32 %v2812_v11, %v1887_v8 }
 0x1ca   : > { %v1903_v35 = vmul.f32 %v1895_v24, %v1863_v4  ;;  %2582 = vmatmul.msk.f32.gmra.mxu1 %vm5281_vm9, %v4210_v61  ;;  %v5304_v4 = vld [vmem:[#allocation15_spill] sm:$0xff] }
 0x1cc   : > { %2138 = vmatpush.msrb.mxu3 %v1903_v35  ;;  %v5305_v35 = vld [vmem:[#allocation18_spill] sm:$0xff] }
 0x1cd   : > { %2589 = vmatmul.msk.f32.vlgmr.msrb.gmra.mxu3 %vm5282_vm4, %v5272_v51  ;;  %2586 = vmatmul.msk.f32.gmra.mxu2 %vm5283_vm1, %v4210_v61 }
 0x1ce   : > { %2579 = vmatmul.msk.f32.gmra.mxu0 %vm5284_vm7, %v4303_v43 }
 0x1d2   : > { %2583 = vmatmul.msk.f32.gmra.mxu1 %vm5285_vm2, %v4303_v43 }
 0x1d5   : > { %2590 = vmatmul.msk.f32.gmra.mxu3 %vm5286_vm3, %v4210_v61  ;;  %2587 = vmatmul.msk.f32.gmra.mxu2 %vm5287_vm6, %v4303_v43  ;;  %v5293_v61 = vld [vmem:[#allocation8_spill] sm:$0xff] }
 0x1d6   : > { %2580 = vmatmul.msk.f32.gmra.mxu0 %vm5288_vm14, %v4352_v37 }
 0x1d8   : > { %v4855_v57 = vpop.permute.xlu1 %2163 }
 0x1da   : > { %2584 = vmatmul.msk.f32.gmra.mxu1 %vm5289_vm0, %v4352_v37 }
 0x1dd   : > { %2591 = vmatmul.msk.f32.gmra.mxu3 %vm5290_vm8, %v4303_v43  ;;  %2588 = vmatmul.msk.f32.gmra.mxu2 %vm5291_vm5, %v4352_v37 }
 0x1e5   : > { %2592 = vmatmul.msk.f32.gmra.mxu3 %vm5292_vm11, %v4352_v37 }
 0x1ea   : > { %v1937_v21 = vpop.f32.mrf.mxu0 }
 0x1eb   : > { %v1938_v30 = vadd.f32 %v1937_v21, %v5293_v61  ;;  %v4870_v3 = vpop.permute.xlu2 %2173 }
 0x1ed   : > { %v2176_v29 = vadd.f32 %v4849_v55, %v1938_v30 }
 0x1ef   : > { %v2208_v0 = vmax.f32 %v2176_v29, 0.0 }
 0x1f1   : > { %2240 = vst [vmem:[%s4852_s12] sm:$0xff] %v2208_v0 }
 0x1f3   : > { %v1940_v43 = vpop.f32.mrf.mxu0 }
 0x1f4   : > { %v1941_v37 = vadd.f32 %v1940_v43, %v5294_v17 }
 0x1f6   : > { %v2184_v10 = vadd.f32 %v4855_v57, %v1941_v37  ;;  %v5306_v37 = vld [vmem:[#allocation19_spill] sm:$0xff] }
 0x1f7   : > { %v4862_v13 = vpop.permute.xlu1 %2168 }
 0x1f8   : > { %v2216_v52 = vmax.f32 %v2184_v10, 0.0 }
 0x1fa   : > { %2248 = vst [vmem:[%s4852_s12 + $0x40] sm:$0xff] %v2216_v52  ;;  %v5307_v52 = vld [vmem:[#allocation22_spill] sm:$0xff] }
 0x1fc   : > { %v1943_v12 = vpop.f32.mrf.mxu0 }
 0x1fd   : > { %v1944_v59 = vadd.f32 %v1943_v12, %v5296_v6 }
 0x1fe   : > { %v1966_v34 = vpop.f32.mrf.mxu1 }
 0x1ff   : > { %v1967_v49 = vadd.f32 %v1966_v34, %v5295_v63  ;;  %v2192_v39 = vadd.f32 %v4862_v13, %v1944_v59  ;;  %v5308_v59 = vld [vmem:[#allocation24_spill] sm:$0xff] }
 0x201   : > { %v2177_v54 = vadd.f32 %v4849_v55, %v1967_v49  ;;  %v2224_v2 = vmax.f32 %v2192_v39, 0.0 }
 0x203   : > { %v2209_v16 = vmax.f32 %v2177_v54, 0.0  ;;  %2256 = vst [vmem:[%s4852_s12 + $0x80] sm:$0xff] %v2224_v2  ;;  %v5309_v2 = vld [vmem:[#allocation23_spill] sm:$0xff] }
 0x204   : > { %v1946_v62 = vpop.f32.mrf.mxu0 }
 0x205   : > { %2241 = vst [vmem:[%s4852_s12 + $0x8] sm:$0xff] %v2209_v16  ;;  %v1947_v19 = vadd.f32 %v1946_v62, %v5298_v20  ;;  %v5310_v20 = vld [vmem:[#allocation25_spill] sm:$0xff] }
 0x206   : > { %v1969_v26 = vpop.f32.mrf.mxu1 }
 0x207   : > { %v1970_v31 = vadd.f32 %v1969_v26, %v5297_v15  ;;  %v2200_v42 = vadd.f32 %v4870_v3, %v1947_v19 }
 0x209   : > { %v2185_v18 = vadd.f32 %v4855_v57, %v1970_v31  ;;  %v2232_v46 = vmax.f32 %v2200_v42, 0.0 }
 0x20b   : > { %v2217_v50 = vmax.f32 %v2185_v18, 0.0  ;;  %2264 = vst [vmem:[%s4852_s12 + $0xc0] sm:$0xff] %v2232_v46  ;;  %v5311_v46 = vld [vmem:[#allocation28_spill] sm:$0xff] }
 0x20d   : > { %2249 = vst [vmem:[%s4852_s12 + $0x48] sm:$0xff] %v2217_v50 }
 0x20e   : > { %v1972_v44 = vpop.f32.mrf.mxu1 }
 0x20f   : > { %v1973_v48 = vadd.f32 %v1972_v44, %v5299_v36 }
 0x211   : > { %v2193_v25 = vadd.f32 %v4862_v13, %v1973_v48 }
 0x213   : > { %v1995_v58 = vpop.f32.mrf.mxu2  ;;  %v2225_v51 = vmax.f32 %v2193_v25, 0.0 }
 0x214   : > { %v1996_v32 = vadd.f32 %v1995_v58, %v5300_v53 }
 0x215   : > { %2257 = vst [vmem:[%s4852_s12 + $0x88] sm:$0xff] %v2225_v51 }
 0x216   : > { %v2178_v27 = vadd.f32 %v4849_v55, %v1996_v32  ;;  %v1975_v9 = vpop.f32.mrf.mxu1  ;;  %v5312_v32 = vld [vmem:[#allocation29_spill] sm:$0xff] }
 0x217   : > { %v1976_v5 = vadd.f32 %v1975_v9, %v5301_v47  ;;  %v5313_v9 = vld [vmem:[#allocation26_spill] sm:$0xff] }
 0x218   : > { %v2210_v14 = vmax.f32 %v2178_v27, 0.0 }
 0x219   : > { %v2201_v41 = vadd.f32 %v4870_v3, %v1976_v5 }
 0x21a   : > { %2242 = vst [vmem:[%s4852_s12 + $0x10] sm:$0xff] %v2210_v14 }
 0x21b   : > { %v1998_v45 = vpop.f32.mrf.mxu2  ;;  %v2233_v11 = vmax.f32 %v2201_v41, 0.0 }
 0x21c   : > { %v1999_v23 = vadd.f32 %v1998_v45, %v5303_v1  ;;  %v5314_v45 = vld [vmem:[#allocation32_spill] sm:$0xff] }
 0x21d   : > { %v2024_v38 = vpop.f32.mrf.mxu3  ;;  %2265 = vst [vmem:[%s4852_s12 + $0xc8] sm:$0xff] %v2233_v11 }
 0x21e   : > { %v2025_v7 = vadd.f32 %v2024_v38, %v5302_v28  ;;  %v2186_v56 = vadd.f32 %v4855_v57, %v1999_v23 }
 0x220   : > { %v2179_v60 = vadd.f32 %v4849_v55, %v2025_v7  ;;  %v2218_v33 = vmax.f32 %v2186_v56, 0.0  ;;  %v5315_v56 = vld [vmem:[#allocation33_spill] sm:$0xff] }
 0x222   : > { %v2211_v40 = vmax.f32 %v2179_v60, 0.0  ;;  %2250 = vst [vmem:[%s4852_s12 + $0x50] sm:$0xff] %v2218_v33 }
 0x223   : > { %v2001_v8 = vpop.f32.mrf.mxu2 }
 0x224   : > { %2243 = vst [vmem:[%s4852_s12 + $0x18] sm:$0xff] %v2211_v40  ;;  %v2002_v21 = vadd.f32 %v2001_v8, %v5305_v35 }
 0x225   : > { %v2027_v22 = vpop.f32.mrf.mxu3 }
 0x226   : > { %v2028_v24 = vadd.f32 %v2027_v22, %v5304_v4  ;;  %v2194_v30 = vadd.f32 %v4862_v13, %v2002_v21  ;;  %v5316_v22 = vld [vmem:[#allocation27_spill] sm:$0xff]  ;;  %v5317_v4 = vld [vmem:[#allocation30_spill] sm:$0xff] }
 0x228   : > { %v2187_v61 = vadd.f32 %v4855_v57, %v2028_v24  ;;  %v2226_v0 = vmax.f32 %v2194_v30, 0.0 }
 0x22a   : > { %v2219_v29 = vmax.f32 %v2187_v61, 0.0  ;;  %2258 = vst [vmem:[%s4852_s12 + $0x90] sm:$0xff] %v2226_v0  ;;  %v5318_v0 = vld [vmem:[#allocation36_spill] sm:$0xff] }
 0x22c   : > { %2251 = vst [vmem:[%s4852_s12 + $0x58] sm:$0xff] %v2219_v29 }
 0x235   : > { %v2030_v43 = vpop.f32.mrf.mxu3 }
 0x236   : > { %v2004_v17 = vpop.f32.mrf.mxu2  ;;  %v2031_v10 = vadd.f32 %v2030_v43, %v5306_v37 }
 0x237   : > { %v2005_v34 = vadd.f32 %v2004_v17, %v5307_v52 }
 0x238   : > { %v2195_v63 = vadd.f32 %v4862_v13, %v2031_v10 }
 0x239   : > { %v2202_v49 = vadd.f32 %v4870_v3, %v2005_v34 }
 0x23a   : > { %v2227_v54 = vmax.f32 %v2195_v63, 0.0  ;;  %v2053_v6 = vpop.f32.mrf.mxu0  ;;  %v5319_v63 = vld [vmem:[#allocation37_spill] sm:$0xff] }
 0x23b   : > { %v2234_v12 = vmax.f32 %v2202_v49, 0.0  ;;  %v2054_v16 = vadd.f32 %v2053_v6, %v5308_v59  ;;  %v5321_v59 = vld [vmem:[#allocation34_spill] sm:$0xff] }
 0x23c   : > { %2259 = vst [vmem:[%s4852_s12 + $0x98] sm:$0xff] %v2227_v54 }
 0x23d   : > { %2266 = vst [vmem:[%s4852_s12 + $0xd0] sm:$0xff] %v2234_v12  ;;  %v2033_v39 = vpop.f32.mrf.mxu3  ;;  %v2180_v26 = vadd.f32 %v4849_v55, %v2054_v16  ;;  %v5320_v12 = vld [vmem:[#allocation31_spill] sm:$0xff] }
 0x23e   : > { %v2034_v15 = vadd.f32 %v2033_v39, %v5309_v2 }
 0x23f   : > { %v2212_v31 = vmax.f32 %v2180_v26, 0.0  ;;  %v2082_v18 = vpop.f32.mrf.mxu1 }
 0x240   : > { %v2203_v62 = vadd.f32 %v4870_v3, %v2034_v15  ;;  %v2083_v19 = vadd.f32 %v2082_v18, %v5310_v20 }
 0x241   : > { %2244 = vst [vmem:[%s4852_s12 + $0x20] sm:$0xff] %v2212_v31 }
 0x242   : > { %v2235_v50 = vmax.f32 %v2203_v62, 0.0  ;;  %v2181_v42 = vadd.f32 %v4849_v55, %v2083_v19  ;;  %v2056_v44 = vpop.f32.mrf.mxu0  ;;  %v5322_v19 = vld [vmem:[#allocation35_spill] sm:$0xff] }
 0x243   : > { %v2057_v36 = vadd.f32 %v2056_v44, %v5311_v46 }
 0x244   : > { %2267 = vst [vmem:[%s4852_s12 + $0xd8] sm:$0xff] %v2235_v50  ;;  %v2213_v48 = vmax.f32 %v2181_v42, 0.0  ;;  %v5323_v42 = vld [vmem:[#allocation38_spill] sm:$0xff] }
 0x245   : > { %v2188_v25 = vadd.f32 %v4855_v57, %v2057_v36 }
 0x246   : > { %2245 = vst [vmem:[%s4852_s12 + $0x28] sm:$0xff] %v2213_v48 }
 0x247   : > { %v2220_v58 = vmax.f32 %v2188_v25, 0.0  ;;  %v2085_v53 = vpop.f32.mrf.mxu1 }
 0x248   : > { %v2086_v51 = vadd.f32 %v2085_v53, %v5312_v32  ;;  %v2111_v27 = vpop.f32.mrf.mxu2 }
 0x249   : > { %2252 = vst [vmem:[%s4852_s12 + $0x60] sm:$0xff] %v2220_v58  ;;  %v2112_v14 = vadd.f32 %v2111_v27, %v5313_v9  ;;  %v5324_v58 = vld [vmem:[#allocation39_spill] sm:$0xff] }
 0x24a   : > { %v2189_v47 = vadd.f32 %v4855_v57, %v2086_v51 }
 0x24b   : > { %v2182_v5 = vadd.f32 %v4849_v55, %v2112_v14  ;;  %v2059_v41 = vpop.f32.mrf.mxu0 }
 0x24c   : > { %v2221_v38 = vmax.f32 %v2189_v47, 0.0  ;;  %v2060_v28 = vadd.f32 %v2059_v41, %v5314_v45 }
 0x24d   : > { %v2214_v7 = vmax.f32 %v2182_v5, 0.0 }
 0x24e   : > { %2253 = vst [vmem:[%s4852_s12 + $0x68] sm:$0xff] %v2221_v38  ;;  %v2196_v1 = vadd.f32 %v4862_v13, %v2060_v28 }
 0x24f   : > { %2246 = vst [vmem:[%s4852_s12 + $0x30] sm:$0xff] %v2214_v7  ;;  %v2088_v23 = vpop.f32.mrf.mxu1 }
 0x250   : > { %v2140_v11 = vpop.f32.mrf.mxu3  ;;  %v2228_v60 = vmax.f32 %v2196_v1, 0.0  ;;  %v2089_v40 = vadd.f32 %v2088_v23, %v5315_v56  ;;  %v2114_v33 = vpop.f32.mrf.mxu2 }
 0x251   : > { %v2141_v8 = vadd.f32 %v2140_v11, %v5316_v22  ;;  %v2115_v24 = vadd.f32 %v2114_v33, %v5317_v4 }
 0x252   : > { %2260 = vst [vmem:[%s4852_s12 + $0xa0] sm:$0xff] %v2228_v60  ;;  %v2197_v35 = vadd.f32 %v4862_v13, %v2089_v40 }
 0x253   : > { %v2183_v21 = vadd.f32 %v4849_v55, %v2141_v8  ;;  %v2190_v61 = vadd.f32 %v4855_v57, %v2115_v24  ;;  %v2062_v30 = vpop.f32.mrf.mxu0 }
 0x254   : > { %v2229_v29 = vmax.f32 %v2197_v35, 0.0  ;;  %v2063_v43 = vadd.f32 %v2062_v30, %v5318_v0 }
 0x255   : > { %v2215_v17 = vmax.f32 %v2183_v21, 0.0  ;;  %v2222_v37 = vmax.f32 %v2190_v61, 0.0 }
 0x256   : > { %2261 = vst [vmem:[%s4852_s12 + $0xa8] sm:$0xff] %v2229_v29  ;;  %v2204_v10 = vadd.f32 %v4870_v3, %v2063_v43 }
 0x257   : > { %2247 = vst [vmem:[%s4852_s12 + $0x38] sm:$0xff] %v2215_v17  ;;  %v2091_v52 = vpop.f32.mrf.mxu1 }
 0x258   : > { %2254 = vst [vmem:[%s4852_s12 + $0x70] sm:$0xff] %v2222_v37  ;;  %v2143_v34 = vpop.f32.mrf.mxu3  ;;  %v2236_v55 = vmax.f32 %v2204_v10, 0.0  ;;  %v2092_v49 = vadd.f32 %v2091_v52, %v5319_v63  ;;  %v2117_v54 = vpop.f32.mrf.mxu2 }
 0x259   : > { %v2144_v6 = vadd.f32 %v2143_v34, %v5320_v12  ;;  %v2118_v16 = vadd.f32 %v2117_v54, %v5321_v59 }
 0x25a   : > { %2268 = vst [vmem:[%s4852_s12 + $0xe0] sm:$0xff] %v2236_v55  ;;  %v2205_v39 = vadd.f32 %v4870_v3, %v2092_v49 }
 0x25b   : > { %v2191_v26 = vadd.f32 %v4855_v57, %v2144_v6  ;;  %v2198_v2 = vadd.f32 %v4862_v13, %v2118_v16 }
 0x25c   : > { %v2237_v15 = vmax.f32 %v2205_v39, 0.0 }
 0x25d   : > { %v2223_v31 = vmax.f32 %v2191_v26, 0.0  ;;  %v2230_v18 = vmax.f32 %v2198_v2, 0.0 }
 0x25e   : > { %2269 = vst [vmem:[%s4852_s12 + $0xe8] sm:$0xff] %v2237_v15 }
 0x25f   : > { %2255 = vst [vmem:[%s4852_s12 + $0x78] sm:$0xff] %v2223_v31 }
 0x260   : > { %2262 = vst [vmem:[%s4852_s12 + $0xb0] sm:$0xff] %v2230_v18  ;;  %v2146_v62 = vpop.f32.mrf.mxu3  ;;  %v2120_v20 = vpop.f32.mrf.mxu2 }
 0x261   : > { %v2147_v50 = vadd.f32 %v2146_v62, %v5322_v19  ;;  %v2121_v44 = vadd.f32 %v2120_v20, %v5323_v42 }
 0x263   : > { %v2199_v46 = vadd.f32 %v4862_v13, %v2147_v50  ;;  %v2206_v57 = vadd.f32 %v4870_v3, %v2121_v44 }
 0x265   : > { %v2231_v36 = vmax.f32 %v2199_v46, 0.0  ;;  %v2238_v48 = vmax.f32 %v2206_v57, 0.0 }
 0x267   : > { %2263 = vst [vmem:[%s4852_s12 + $0xb8] sm:$0xff] %v2231_v36 }
 0x268   : > { %2270 = vst [vmem:[%s4852_s12 + $0xf0] sm:$0xff] %v2238_v48  ;;  %v2149_v25 = vpop.f32.mrf.mxu3 }
 0x269   : > { %v2150_v53 = vadd.f32 %v2149_v25, %v5324_v58 }
 0x26b   : > { %v2207_v13 = vadd.f32 %v4870_v3, %v2150_v53 }
 0x26d   : > { %v2239_v32 = vmax.f32 %v2207_v13, 0.0 }
 0x26f   : > { %2271 = vst [vmem:[%s4852_s12 + $0xf8] sm:$0xff] %v2239_v32 }
 0x270   : > { %2870 = shalt.err (!%p2867_p0)
}
 0x271   : > { %s2928_s10 = smov 1024   ;;  %s2929_s12 = smov 64  }
 0x272   : > { %2603 = dma.vmem_to_hbm [thread:$0]  (%p3021_p9), %s2288_s17, 4096, %s2290_s13, %s2273_s27, %s2928_s10, %s2928_s10, %s2929_s12  }
 0x273 PF: > { %s2304_s20 = sand.u32 1, %s2905_s24   ;;  %p2610_p1 = pnand %p2408_p12, %p3028_p11 }
 0x274   : > { %s2305_s11 = scalar_lea.sflag [#allocation4], %s2304_s20 }
 0x275   : > { %p2611_p2 = pneg %p2610_p1 }
 0x277   : > { %2900 = dma.done.wait (%p2611_p2), %s2305_s11, 4096  }
 0x278   : > { %2902 = vsyncadd (%p2611_p2), %s2305_s11, 4294963200  ;;  %s23_s29 = sadd.s32 1, %s2925_s29   ;;  %s5325_s24 = smov %s2909_s25 }
 0x279   : > { %p20_p3 = scmp.ge.s32.totalorder %s23_s29, 4   ;;  %s5326_s25 = smov %s2913_s26 }
 0x27a   : > { %s5327_s26 = smov %s3026_s15  ;;  %s5328_s27 = smov %s2921_s28 }
 0x27b   : > { %s5329_s28 = smov %s5331_s9  ;;  %22 = sbr.rel (!%p20_p3) target bundleno = 6 (0x6), region = 99 }
 0x280   :  { %2311 = vsyncpa [#allocation3], 1 }
 0x281   :  { %2313 = vsyncpa [#allocation3 + $0x1], 1 }
 0x282   :  { %2314 = vsyncpa [#allocation4], 1 }
 0x283   :  { %2316 = vsyncpa [#allocation4 + $0x1], 1 }

</bundles_post_ra>
